<compile_context>
chip_gen: v7x
topology: tpu7x:2x2x1
jax: 0.10.0
libtpu: 0.0.40
codegen_flags: <defaults>
</compile_context>

<pallas_src>
import functools

import jax
import jax.numpy as jnp
from jax.experimental import pallas as pl
from jax.experimental.pallas import tpu as pltpu


# ----------------------------------------------------------------------------
# In-kernel helpers (all f32 element-wise math; portable across v5e/v6e/v7x)
# ----------------------------------------------------------------------------
def _layernorm(x, gamma, beta, eps=1e-5):
    mu = jnp.mean(x, axis=-1, keepdims=True)
    var = jnp.mean((x - mu) ** 2, axis=-1, keepdims=True)
    return (x - mu) * jax.lax.rsqrt(var + eps) * gamma + beta


def _gelu_exact(x):
    # PyTorch nn.GELU default: 0.5*x*(1+erf(x/sqrt(2)))
    return 0.5 * x * (1.0 + jax.lax.erf(x * 0.7071067811865475))


# ----------------------------------------------------------------------------
# Fused per-layer kernel: PreNorm(Attention)+residual ; PreNorm(FFN)+residual
# Grid = (batch, query-tile).  K/V cached in scratch across query tiles.
# ----------------------------------------------------------------------------
def layer_kernel(x_ref,
                 g1_ref, be1_ref,
                 wq_ref, wk_ref, wv_ref, wo_ref, bo_ref,
                 g2_ref, be2_ref,
                 w1_ref, b1_ref, w2_ref, b2_ref,
                 o_ref,
                 k_scr, v_scr, q_scr,
                 *, heads, dim_head, q_tile):
    f32, bf16 = jnp.float32, jnp.bfloat16
    H, dh = heads, dim_head
    qi = pl.program_id(1)

    # ---- K/V for the whole sequence: computed once per batch (qi == 0), cached
    #      in VMEM scratch across all query tiles (qi axis is "arbitrary").
    @pl.when(qi == 0)
    def _():
        xf = x_ref[0].astype(f32)                                       # (N, D)
        xnf = _layernorm(xf, g1_ref[...], be1_ref[...]).astype(bf16)
        # full-width projections: (N, D) @ (D, H*dh)  -> MXU-friendly output width
        k2 = jnp.dot(xnf, wk_ref[...], preferred_element_type=f32).astype(bf16)
        v2 = jnp.dot(xnf, wv_ref[...], preferred_element_type=f32).astype(bf16)
        # head-major scratch so each head is a cheap leading-index view.
        # Static loop = data movement only (no per-head matmuls unrolled).
        for h in range(H):
            k_scr[h] = k2[:, h * dh:(h + 1) * dh]
            v_scr[h] = v2[:, h * dh:(h + 1) * dh]

    # ---- query tile, sliced from the VMEM-resident full-sequence block ----
    start = qi * q_tile
    if q_tile % 8 == 0:
        start = pl.multiple_of(start, 8)
    xq = x_ref[0, pl.ds(start, q_tile), :].astype(f32)                  # (TQ, D)

    # ---- PreNorm(Attention) ----
    xnq = _layernorm(xq, g1_ref[...], be1_ref[...]).astype(bf16)
    # full-width Q projection (1/sqrt(dh) already folded into Wq at init time)
    q2 = jnp.dot(xnq, wq_ref[...], preferred_element_type=f32).astype(bf16)   # (TQ, H*dh)
    for h in range(H):                                                  # staging only
        q_scr[h] = q2[:, h * dh:(h + 1) * dh]

    q3 = q_scr[...]                                                     # (H, TQ, dh) bf16
    k3 = k_scr[...]                                                     # (H, N,  dh) bf16
    v3 = v_scr[...]                                                     # (H, N,  dh) bf16

    # head-batched attention (leading batch dim, canonical flash-style einsums)
    s = jnp.einsum("hqd,hkd->hqk", q3, k3, preferred_element_type=f32)  # (H, TQ, N)
    s = s - jnp.max(s, axis=-1, keepdims=True)
    e = jnp.exp(s)                                                      # f32 (portable; bf16 exp is a v6e/v7x-only option)
    probs = e * pl.reciprocal(jnp.sum(e, axis=-1, keepdims=True), approx=True)
    o3 = jnp.einsum("hqk,hkd->hqd", probs.astype(bf16), v3,
                    preferred_element_type=f32)                         # (H, TQ, dh)

    # concat heads along lanes -> ONE fat output projection (H*dh, D)
    o3 = o3.astype(bf16)
    o2 = jnp.concatenate([o3[h] for h in range(H)], axis=-1)            # (TQ, H*dh)
    attn_out = jnp.dot(o2, wo_ref[...], preferred_element_type=f32) + bo_ref[...]

    # dropout p=0.0 -> identity
    x1 = attn_out + xq                                                  # residual 1 (f32)

    # ---- PreNorm(FeedForward) ----
    xn2 = _layernorm(x1, g2_ref[...], be2_ref[...]).astype(bf16)
    hid = jnp.dot(xn2, w1_ref[...], preferred_element_type=f32) + b1_ref[...]
    hid = _gelu_exact(hid)
    y = jnp.dot(hid.astype(bf16), w2_ref[...], preferred_element_type=f32) + b2_ref[...]

    o_ref[0] = (y + x1).astype(o_ref.dtype)                             # residual 2


# ----------------------------------------------------------------------------
# Pallas wrapper: one call per transformer layer
# ----------------------------------------------------------------------------
def _pick_q_tile(n, q_tile):
    """Largest multiple of 8 that divides n and is <= q_tile; else full sequence."""
    t = min(q_tile, n)
    t -= t % 8
    while t >= 8:
        if n % t == 0:
            return t
        t -= 8
    return n


def transformer_layer(x, p, *, heads, dim_head, q_tile=256):
    B, N, D = x.shape
    hd = heads * dim_head
    mlp = p["w1"].shape[1]
    TQ = _pick_q_tile(N, q_tile)
    grid = (B, N // TQ)

    const = lambda b, qi: (0, 0)
    kernel = functools.partial(layer_kernel, heads=heads, dim_head=dim_head, q_tile=TQ)

    # NOTE: for real runs keep D >= 128 so output stores are lane-dense; the
    # D=32 demo below hits masked partial stores (benchmark at ViT sizes, not here).
    return pl.pallas_call(
        kernel,
        out_shape=jax.ShapeDtypeStruct((B, N, D), x.dtype),
        grid=grid,
        in_specs=[
            pl.BlockSpec((1, N, D), lambda b, qi: (b, 0, 0)),   # x: full seq, VMEM-resident per batch
            pl.BlockSpec((1, D), const),                        # ln1 gamma
            pl.BlockSpec((1, D), const),                        # ln1 beta
            pl.BlockSpec((D, hd), const),                       # Wq (bf16, scale folded in)
            pl.BlockSpec((D, hd), const),                       # Wk (bf16)
            pl.BlockSpec((D, hd), const),                       # Wv (bf16)
            pl.BlockSpec((hd, D), const),                       # Wout (bf16)
            pl.BlockSpec((1, D), const),                        # bout
            pl.BlockSpec((1, D), const),                        # ln2 gamma
            pl.BlockSpec((1, D), const),                        # ln2 beta
            pl.BlockSpec((D, mlp), const),                      # W1 (bf16)
            pl.BlockSpec((1, mlp), const),                      # b1
            pl.BlockSpec((mlp, D), const),                      # W2 (bf16)
            pl.BlockSpec((1, D), const),                        # b2
        ],
        out_specs=pl.BlockSpec((1, TQ, D), lambda b, qi: (b, qi, 0)),
        scratch_shapes=[
            pltpu.VMEM((heads, N, dim_head), jnp.bfloat16),     # K cache (per batch, reused across qi)
            pltpu.VMEM((heads, N, dim_head), jnp.bfloat16),     # V cache
            pltpu.VMEM((heads, TQ, dim_head), jnp.bfloat16),    # Q head-major staging
        ],
        compiler_params=pltpu.CompilerParams(
            # batch shards across TensorCores; qi must iterate sequentially on one
            # core so the K/V scratch cache stays valid -> "arbitrary".
            dimension_semantics=("parallel", "arbitrary"),
            # safe on all chips (== v7x physical); raise toward ~100 MiB on v5e/v6e.
            vmem_limit_bytes=64 * 1024 * 1024,
        ),
    )(x,
      p["ln1_g"], p["ln1_b"],
      p["wq"], p["wk"], p["wv"], p["wout"], p["bout"],
      p["ln2_g"], p["ln2_b"],
      p["w1"], p["b1"], p["w2"], p["b2"])


def transformer_forward(x, layers, *, heads, dim_head):
    for p in layers:
        x = transformer_layer(x, p, heads=heads, dim_head=dim_head)
    return x


# ----------------------------------------------------------------------------
# Deterministic parameter init.
# Matmul weights stored bf16, fused layouts: Wq/Wk/Wv = (D, heads*dh),
# Wout = (heads*dh, D).  1/sqrt(dh) folded into Wq once at init.
# LayerNorm params and biases stay f32 (added to f32 accumulators).
# ----------------------------------------------------------------------------
def init_params(key, dim, depth, heads, dim_head, mlp_dim):
    hd = heads * dim_head
    scale = dim_head ** -0.5
    layers = []
    for li in range(depth):
        ks = jax.random.split(jax.random.fold_in(key, li), 8)
        layers.append(dict(
            ln1_g=jnp.ones((1, dim), jnp.float32),
            ln1_b=jnp.zeros((1, dim), jnp.float32),
            wq=(scale * 0.05 * jax.random.normal(ks[0], (dim, hd))).astype(jnp.bfloat16),
            wk=(0.05 * jax.random.normal(ks[1], (dim, hd))).astype(jnp.bfloat16),
            wv=(0.05 * jax.random.normal(ks[2], (dim, hd))).astype(jnp.bfloat16),
            wout=(0.05 * jax.random.normal(ks[3], (hd, dim))).astype(jnp.bfloat16),
            bout=0.01 * jax.random.normal(ks[4], (1, dim), jnp.float32),
            ln2_g=jnp.ones((1, dim), jnp.float32),
            ln2_b=jnp.zeros((1, dim), jnp.float32),
            w1=(0.05 * jax.random.normal(ks[5], (dim, mlp_dim))).astype(jnp.bfloat16),
            b1=0.01 * jax.random.normal(ks[6], (1, mlp_dim), jnp.float32),
            w2=(0.05 * jax.random.normal(ks[7], (mlp_dim, dim))).astype(jnp.bfloat16),
            b2=jnp.zeros((1, dim), jnp.float32),
        ))
    return layers


# ----------------------------------------------------------------------------
# Pure-JAX f32 reference (same math; bf16-stored weights upcast to f32).
# The 1/sqrt(dh) scale is already folded into wq, so it is not re-applied.
# ----------------------------------------------------------------------------
def transformer_ref(x, layers, *, heads, dim_head):
    f32 = jnp.float32
    H, dh = heads, dim_head
    B, N, _ = x.shape
    for p in layers:
        xn = _layernorm(x, p["ln1_g"], p["ln1_b"])
        q = (xn @ p["wq"].astype(f32)).reshape(B, N, H, dh).transpose(0, 2, 1, 3)
        k = (xn @ p["wk"].astype(f32)).reshape(B, N, H, dh).transpose(0, 2, 1, 3)
        v = (xn @ p["wv"].astype(f32)).reshape(B, N, H, dh).transpose(0, 2, 1, 3)
        dots = jnp.einsum("bhqe,bhke->bhqk", q, k)
        attn = jax.nn.softmax(dots, axis=-1)
        out = jnp.einsum("bhqk,bhke->bhqe", attn, v)
        out = out.transpose(0, 2, 1, 3).reshape(B, N, H * dh)
        x = out @ p["wout"].astype(f32) + p["bout"] + x
        xn2 = _layernorm(x, p["ln2_g"], p["ln2_b"])
        h = _gelu_exact(xn2 @ p["w1"].astype(f32) + p["b1"])
        x = h @ p["w2"].astype(f32) + p["b2"] + x
    return x


# ----------------------------------------------------------------------------
if __name__ == "__main__":
    B, N, DIM = 2, 8, 32
    DEPTH, HEADS, DIM_HEAD, MLP_DIM = 2, 4, 16, 64

    key = jax.random.PRNGKey(0)
    kx, kp = jax.random.split(key)
    x = jax.random.normal(kx, (B, N, DIM), jnp.float32)
    layers = init_params(kp, DIM, DEPTH, HEADS, DIM_HEAD, MLP_DIM)

    out = transformer_forward(x, layers, heads=HEADS, dim_head=DIM_HEAD)
    out = jax.block_until_ready(out)

    ref = transformer_ref(x, layers, heads=HEADS, dim_head=DIM_HEAD)
    assert out.shape == (B, N, DIM)
    # kernel uses bf16 MXU operands with f32 accumulation -> small numeric delta vs f32 ref
    assert jnp.allclose(out, ref, atol=2e-2, rtol=2e-2), "mismatch vs reference"

    print("KERNEL_OK")
</pallas_src>

<mosaic_0001>
module attributes {stable_mosaic.version = 11 : i64} {
  func.func @layer_kernel(%arg0: i32, %arg1: i32, %arg2: memref<1x8x32xf32, #tpu.memory_space<vmem>>, %arg3: memref<1x32xf32, #tpu.memory_space<vmem>>, %arg4: memref<1x32xf32, #tpu.memory_space<vmem>>, %arg5: memref<32x64xbf16, #tpu.memory_space<vmem>>, %arg6: memref<32x64xbf16, #tpu.memory_space<vmem>>, %arg7: memref<32x64xbf16, #tpu.memory_space<vmem>>, %arg8: memref<64x32xbf16, #tpu.memory_space<vmem>>, %arg9: memref<1x32xf32, #tpu.memory_space<vmem>>, %arg10: memref<1x32xf32, #tpu.memory_space<vmem>>, %arg11: memref<1x32xf32, #tpu.memory_space<vmem>>, %arg12: memref<32x64xbf16, #tpu.memory_space<vmem>>, %arg13: memref<1x64xf32, #tpu.memory_space<vmem>>, %arg14: memref<64x32xbf16, #tpu.memory_space<vmem>>, %arg15: memref<1x32xf32, #tpu.memory_space<vmem>>, %arg16: memref<1x8x32xf32, #tpu.memory_space<vmem>>, %arg17: memref<4x8x16xbf16, #tpu.memory_space<vmem>>, %arg18: memref<4x8x16xbf16, #tpu.memory_space<vmem>>, %arg19: memref<4x8x16xbf16, #tpu.memory_space<vmem>>) attributes {dimension_semantics = [#tpu.dimension_semantics<parallel>, #tpu.dimension_semantics<arbitrary>], iteration_bounds = array<i64: 2, 1>, scalar_prefetch = 0 : i64, scratch_operands = 3 : i64, tpu.core_type = #tpu.core_type<tc>, window_params = [{transform_indices = @transform_0, window_bounds = array<i64: 1, 8, 32>}, {pipeline_mode = #tpu.pipeline_mode<synchronous>, transform_indices = @transform_1, window_bounds = array<i64: 1, 32>}, {pipeline_mode = #tpu.pipeline_mode<synchronous>, transform_indices = @transform_2, window_bounds = array<i64: 1, 32>}, {pipeline_mode = #tpu.pipeline_mode<synchronous>, transform_indices = @transform_3, window_bounds = array<i64: 32, 64>}, {pipeline_mode = #tpu.pipeline_mode<synchronous>, transform_indices = @transform_4, window_bounds = array<i64: 32, 64>}, {pipeline_mode = #tpu.pipeline_mode<synchronous>, transform_indices = @transform_5, window_bounds = array<i64: 32, 64>}, {pipeline_mode = #tpu.pipeline_mode<synchronous>, transform_indices = @transform_6, window_bounds = array<i64: 64, 32>}, {pipeline_mode = #tpu.pipeline_mode<synchronous>, transform_indices = @transform_7, window_bounds = array<i64: 1, 32>}, {pipeline_mode = #tpu.pipeline_mode<synchronous>, transform_indices = @transform_8, window_bounds = array<i64: 1, 32>}, {pipeline_mode = #tpu.pipeline_mode<synchronous>, transform_indices = @transform_9, window_bounds = array<i64: 1, 32>}, {pipeline_mode = #tpu.pipeline_mode<synchronous>, transform_indices = @transform_10, window_bounds = array<i64: 32, 64>}, {pipeline_mode = #tpu.pipeline_mode<synchronous>, transform_indices = @transform_11, window_bounds = array<i64: 1, 64>}, {pipeline_mode = #tpu.pipeline_mode<synchronous>, transform_indices = @transform_12, window_bounds = array<i64: 64, 32>}, {pipeline_mode = #tpu.pipeline_mode<synchronous>, transform_indices = @transform_13, window_bounds = array<i64: 1, 32>}, {transform_indices = @transform_14, window_bounds = array<i64: 1, 8, 32>}]} {
    %c0_i32 = arith.constant 0 : i32
    %0 = arith.cmpi eq, %arg1, %c0_i32 : i32
    %1 = arith.extui %0 : i1 to i32
    %c0_i32_0 = arith.constant 0 : i32
    %2 = arith.cmpi ne, %1, %c0_i32_0 : i32
    scf.if %2 {
      %c0_65 = arith.constant 0 : index
      %c0_66 = arith.constant 0 : index
      %c0_67 = arith.constant 0 : index
      %132 = vector.load %arg2[%c0_65, %c0_66, %c0_67] : memref<1x8x32xf32, #tpu.memory_space<vmem>>, vector<1x8x32xf32>
      %133 = vector.shape_cast %132 : vector<1x8x32xf32> to vector<8x32xf32>
      %c0_68 = arith.constant 0 : index
      %c0_69 = arith.constant 0 : index
      %134 = vector.load %arg3[%c0_68, %c0_69] : memref<1x32xf32, #tpu.memory_space<vmem>>, vector<1x32xf32>
      %c0_70 = arith.constant 0 : index
      %c0_71 = arith.constant 0 : index
      %135 = vector.load %arg4[%c0_70, %c0_71] : memref<1x32xf32, #tpu.memory_space<vmem>>, vector<1x32xf32>
      %cst_72 = arith.constant dense<0.000000e+00> : vector<8xf32>
      %136 = vector.multi_reduction <add>, %133, %cst_72 [1] : vector<8x32xf32> to vector<8xf32>
      %137 = vector.shape_cast %136 : vector<8xf32> to vector<8x1xf32>
      %cst_73 = arith.constant 3.200000e+01 : f32
      %138 = vector.broadcast %cst_73 : f32 to vector<8x1xf32>
      %139 = arith.divf %137, %138 : vector<8x1xf32>
      %140 = vector.broadcast %139 : vector<8x1xf32> to vector<8x32xf32>
      %141 = arith.subf %133, %140 : vector<8x32xf32>
      %142 = arith.mulf %141, %141 : vector<8x32xf32>
      %cst_74 = arith.constant dense<0.000000e+00> : vector<8xf32>
      %143 = vector.multi_reduction <add>, %142, %cst_74 [1] : vector<8x32xf32> to vector<8xf32>
      %144 = vector.shape_cast %143 : vector<8xf32> to vector<8x1xf32>
      %cst_75 = arith.constant 3.200000e+01 : f32
      %145 = vector.broadcast %cst_75 : f32 to vector<8x1xf32>
      %146 = arith.divf %144, %145 : vector<8x1xf32>
      %147 = vector.broadcast %139 : vector<8x1xf32> to vector<8x32xf32>
      %148 = arith.subf %133, %147 : vector<8x32xf32>
      %cst_76 = arith.constant 9.99999974E-6 : f32
      %149 = vector.broadcast %cst_76 : f32 to vector<8x1xf32>
      %150 = arith.addf %146, %149 : vector<8x1xf32>
      %151 = math.rsqrt %150 : vector<8x1xf32>
      %152 = vector.broadcast %151 : vector<8x1xf32> to vector<8x32xf32>
      %153 = arith.mulf %148, %152 : vector<8x32xf32>
      %154 = vector.broadcast %134 : vector<1x32xf32> to vector<8x32xf32>
      %155 = arith.mulf %153, %154 : vector<8x32xf32>
      %156 = vector.broadcast %135 : vector<1x32xf32> to vector<8x32xf32>
      %157 = arith.addf %155, %156 : vector<8x32xf32>
      %158 = arith.truncf %157 : vector<8x32xf32> to vector<8x32xbf16>
      %c0_77 = arith.constant 0 : index
      %c0_78 = arith.constant 0 : index
      %159 = vector.load %arg6[%c0_77, %c0_78] : memref<32x64xbf16, #tpu.memory_space<vmem>>, vector<32x64xbf16>
      %cst_79 = arith.constant dense<0.000000e+00> : vector<8x64xf32>
      %160 = tpu.matmul %158, %159, %cst_79 {dimension_numbers = #tpu.dot_dimension_numbers<[1], [0], [0], [1], [0, 0, 1, 1], [], []>} : vector<8x32xbf16>, vector<32x64xbf16>, vector<8x64xf32> -> vector<8x64xf32>
      %161 = arith.truncf %160 : vector<8x64xf32> to vector<8x64xbf16>
      %c0_80 = arith.constant 0 : index
      %c0_81 = arith.constant 0 : index
      %162 = vector.load %arg7[%c0_80, %c0_81] : memref<32x64xbf16, #tpu.memory_space<vmem>>, vector<32x64xbf16>
      %cst_82 = arith.constant dense<0.000000e+00> : vector<8x64xf32>
      %163 = tpu.matmul %158, %162, %cst_82 {dimension_numbers = #tpu.dot_dimension_numbers<[1], [0], [0], [1], [0, 0, 1, 1], [], []>} : vector<8x32xbf16>, vector<32x64xbf16>, vector<8x64xf32> -> vector<8x64xf32>
      %164 = arith.truncf %163 : vector<8x64xf32> to vector<8x64xbf16>
      %165 = vector.extract_strided_slice %161 {offsets = [0, 0], sizes = [8, 16], strides = [1, 1]} : vector<8x64xbf16> to vector<8x16xbf16>
      %c0_83 = arith.constant 0 : index
      %c0_84 = arith.constant 0 : index
      %c0_85 = arith.constant 0 : index
      %166 = vector.load %arg17[%c0_83, %c0_84, %c0_85] : memref<4x8x16xbf16, #tpu.memory_space<vmem>>, vector<1x8x16xbf16>
      %167 = vector.shape_cast %166 : vector<1x8x16xbf16> to vector<8x16xbf16>
      %168 = vector.shape_cast %165 : vector<8x16xbf16> to vector<1x8x16xbf16>
      tpu.vector_store %arg17[%c0_83, %c0_84, %c0_85], %168 {strides = array<i32>} : memref<4x8x16xbf16, #tpu.memory_space<vmem>>, vector<1x8x16xbf16>,
      %169 = vector.extract_strided_slice %164 {offsets = [0, 0], sizes = [8, 16], strides = [1, 1]} : vector<8x64xbf16> to vector<8x16xbf16>
      %c0_86 = arith.constant 0 : index
      %c0_87 = arith.constant 0 : index
      %c0_88 = arith.constant 0 : index
      %170 = vector.load %arg18[%c0_86, %c0_87, %c0_88] : memref<4x8x16xbf16, #tpu.memory_space<vmem>>, vector<1x8x16xbf16>
      %171 = vector.shape_cast %170 : vector<1x8x16xbf16> to vector<8x16xbf16>
      %172 = vector.shape_cast %169 : vector<8x16xbf16> to vector<1x8x16xbf16>
      tpu.vector_store %arg18[%c0_86, %c0_87, %c0_88], %172 {strides = array<i32>} : memref<4x8x16xbf16, #tpu.memory_space<vmem>>, vector<1x8x16xbf16>,
      %173 = vector.extract_strided_slice %161 {offsets = [0, 16], sizes = [8, 16], strides = [1, 1]} : vector<8x64xbf16> to vector<8x16xbf16>
      %c1_89 = arith.constant 1 : index
      %c0_90 = arith.constant 0 : index
      %c0_91 = arith.constant 0 : index
      %174 = vector.load %arg17[%c1_89, %c0_90, %c0_91] : memref<4x8x16xbf16, #tpu.memory_space<vmem>>, vector<1x8x16xbf16>
      %175 = vector.shape_cast %174 : vector<1x8x16xbf16> to vector<8x16xbf16>
      %176 = vector.shape_cast %173 : vector<8x16xbf16> to vector<1x8x16xbf16>
      tpu.vector_store %arg17[%c1_89, %c0_90, %c0_91], %176 {strides = array<i32>} : memref<4x8x16xbf16, #tpu.memory_space<vmem>>, vector<1x8x16xbf16>,
      %177 = vector.extract_strided_slice %164 {offsets = [0, 16], sizes = [8, 16], strides = [1, 1]} : vector<8x64xbf16> to vector<8x16xbf16>
      %c1_92 = arith.constant 1 : index
      %c0_93 = arith.constant 0 : index
      %c0_94 = arith.constant 0 : index
      %178 = vector.load %arg18[%c1_92, %c0_93, %c0_94] : memref<4x8x16xbf16, #tpu.memory_space<vmem>>, vector<1x8x16xbf16>
      %179 = vector.shape_cast %178 : vector<1x8x16xbf16> to vector<8x16xbf16>
      %180 = vector.shape_cast %177 : vector<8x16xbf16> to vector<1x8x16xbf16>
      tpu.vector_store %arg18[%c1_92, %c0_93, %c0_94], %180 {strides = array<i32>} : memref<4x8x16xbf16, #tpu.memory_space<vmem>>, vector<1x8x16xbf16>,
      %181 = vector.extract_strided_slice %161 {offsets = [0, 32], sizes = [8, 16], strides = [1, 1]} : vector<8x64xbf16> to vector<8x16xbf16>
      %c2_95 = arith.constant 2 : index
      %c0_96 = arith.constant 0 : index
      %c0_97 = arith.constant 0 : index
      %182 = vector.load %arg17[%c2_95, %c0_96, %c0_97] : memref<4x8x16xbf16, #tpu.memory_space<vmem>>, vector<1x8x16xbf16>
      %183 = vector.shape_cast %182 : vector<1x8x16xbf16> to vector<8x16xbf16>
      %184 = vector.shape_cast %181 : vector<8x16xbf16> to vector<1x8x16xbf16>
      tpu.vector_store %arg17[%c2_95, %c0_96, %c0_97], %184 {strides = array<i32>} : memref<4x8x16xbf16, #tpu.memory_space<vmem>>, vector<1x8x16xbf16>,
      %185 = vector.extract_strided_slice %164 {offsets = [0, 32], sizes = [8, 16], strides = [1, 1]} : vector<8x64xbf16> to vector<8x16xbf16>
      %c2_98 = arith.constant 2 : index
      %c0_99 = arith.constant 0 : index
      %c0_100 = arith.constant 0 : index
      %186 = vector.load %arg18[%c2_98, %c0_99, %c0_100] : memref<4x8x16xbf16, #tpu.memory_space<vmem>>, vector<1x8x16xbf16>
      %187 = vector.shape_cast %186 : vector<1x8x16xbf16> to vector<8x16xbf16>
      %188 = vector.shape_cast %185 : vector<8x16xbf16> to vector<1x8x16xbf16>
      tpu.vector_store %arg18[%c2_98, %c0_99, %c0_100], %188 {strides = array<i32>} : memref<4x8x16xbf16, #tpu.memory_space<vmem>>, vector<1x8x16xbf16>,
      %189 = vector.extract_strided_slice %161 {offsets = [0, 48], sizes = [8, 16], strides = [1, 1]} : vector<8x64xbf16> to vector<8x16xbf16>
      %c3_101 = arith.constant 3 : index
      %c0_102 = arith.constant 0 : index
      %c0_103 = arith.constant 0 : index
      %190 = vector.load %arg17[%c3_101, %c0_102, %c0_103] : memref<4x8x16xbf16, #tpu.memory_space<vmem>>, vector<1x8x16xbf16>
      %191 = vector.shape_cast %190 : vector<1x8x16xbf16> to vector<8x16xbf16>
      %192 = vector.shape_cast %189 : vector<8x16xbf16> to vector<1x8x16xbf16>
      tpu.vector_store %arg17[%c3_101, %c0_102, %c0_103], %192 {strides = array<i32>} : memref<4x8x16xbf16, #tpu.memory_space<vmem>>, vector<1x8x16xbf16>,
      %193 = vector.extract_strided_slice %164 {offsets = [0, 48], sizes = [8, 16], strides = [1, 1]} : vector<8x64xbf16> to vector<8x16xbf16>
      %c3_104 = arith.constant 3 : index
      %c0_105 = arith.constant 0 : index
      %c0_106 = arith.constant 0 : index
      %194 = vector.load %arg18[%c3_104, %c0_105, %c0_106] : memref<4x8x16xbf16, #tpu.memory_space<vmem>>, vector<1x8x16xbf16>
      %195 = vector.shape_cast %194 : vector<1x8x16xbf16> to vector<8x16xbf16>
      %196 = vector.shape_cast %193 : vector<8x16xbf16> to vector<1x8x16xbf16>
      tpu.vector_store %arg18[%c3_104, %c0_105, %c0_106], %196 {strides = array<i32>} : memref<4x8x16xbf16, #tpu.memory_space<vmem>>, vector<1x8x16xbf16>,
    } else {
    }
    %c8_i32 = arith.constant 8 : i32
    %3 = arith.muli %arg1, %c8_i32 : i32
    %4 = tpu.assume_multiple %3, 8 : i32
    %c0 = arith.constant 0 : index
    %5 = arith.index_cast %4 : i32 to index
    %c0_1 = arith.constant 0 : index
    %6 = vector.load %arg2[%c0, %5, %c0_1] : memref<1x8x32xf32, #tpu.memory_space<vmem>>, vector<1x8x32xf32>
    %7 = vector.shape_cast %6 : vector<1x8x32xf32> to vector<8x32xf32>
    %c0_2 = arith.constant 0 : index
    %c0_3 = arith.constant 0 : index
    %8 = vector.load %arg3[%c0_2, %c0_3] : memref<1x32xf32, #tpu.memory_space<vmem>>, vector<1x32xf32>
    %c0_4 = arith.constant 0 : index
    %c0_5 = arith.constant 0 : index
    %9 = vector.load %arg4[%c0_4, %c0_5] : memref<1x32xf32, #tpu.memory_space<vmem>>, vector<1x32xf32>
    %cst = arith.constant dense<0.000000e+00> : vector<8xf32>
    %10 = vector.multi_reduction <add>, %7, %cst [1] : vector<8x32xf32> to vector<8xf32>
    %11 = vector.shape_cast %10 : vector<8xf32> to vector<8x1xf32>
    %cst_6 = arith.constant 3.200000e+01 : f32
    %12 = vector.broadcast %cst_6 : f32 to vector<8x1xf32>
    %13 = arith.divf %11, %12 : vector<8x1xf32>
    %14 = vector.broadcast %13 : vector<8x1xf32> to vector<8x32xf32>
    %15 = arith.subf %7, %14 : vector<8x32xf32>
    %16 = arith.mulf %15, %15 : vector<8x32xf32>
    %cst_7 = arith.constant dense<0.000000e+00> : vector<8xf32>
    %17 = vector.multi_reduction <add>, %16, %cst_7 [1] : vector<8x32xf32> to vector<8xf32>
    %18 = vector.shape_cast %17 : vector<8xf32> to vector<8x1xf32>
    %cst_8 = arith.constant 3.200000e+01 : f32
    %19 = vector.broadcast %cst_8 : f32 to vector<8x1xf32>
    %20 = arith.divf %18, %19 : vector<8x1xf32>
    %21 = vector.broadcast %13 : vector<8x1xf32> to vector<8x32xf32>
    %22 = arith.subf %7, %21 : vector<8x32xf32>
    %cst_9 = arith.constant 9.99999974E-6 : f32
    %23 = vector.broadcast %cst_9 : f32 to vector<8x1xf32>
    %24 = arith.addf %20, %23 : vector<8x1xf32>
    %25 = math.rsqrt %24 : vector<8x1xf32>
    %26 = vector.broadcast %25 : vector<8x1xf32> to vector<8x32xf32>
    %27 = arith.mulf %22, %26 : vector<8x32xf32>
    %28 = vector.broadcast %8 : vector<1x32xf32> to vector<8x32xf32>
    %29 = arith.mulf %27, %28 : vector<8x32xf32>
    %30 = vector.broadcast %9 : vector<1x32xf32> to vector<8x32xf32>
    %31 = arith.addf %29, %30 : vector<8x32xf32>
    %32 = arith.truncf %31 : vector<8x32xf32> to vector<8x32xbf16>
    %c0_10 = arith.constant 0 : index
    %c0_11 = arith.constant 0 : index
    %33 = vector.load %arg5[%c0_10, %c0_11] : memref<32x64xbf16, #tpu.memory_space<vmem>>, vector<32x64xbf16>
    %cst_12 = arith.constant dense<0.000000e+00> : vector<8x64xf32>
    %34 = tpu.matmul %32, %33, %cst_12 {dimension_numbers = #tpu.dot_dimension_numbers<[1], [0], [0], [1], [0, 0, 1, 1], [], []>} : vector<8x32xbf16>, vector<32x64xbf16>, vector<8x64xf32> -> vector<8x64xf32>
    %35 = arith.truncf %34 : vector<8x64xf32> to vector<8x64xbf16>
    %36 = vector.extract_strided_slice %35 {offsets = [0, 0], sizes = [8, 16], strides = [1, 1]} : vector<8x64xbf16> to vector<8x16xbf16>
    %c0_13 = arith.constant 0 : index
    %c0_14 = arith.constant 0 : index
    %c0_15 = arith.constant 0 : index
    %37 = vector.load %arg19[%c0_13, %c0_14, %c0_15] : memref<4x8x16xbf16, #tpu.memory_space<vmem>>, vector<1x8x16xbf16>
    %38 = vector.shape_cast %37 : vector<1x8x16xbf16> to vector<8x16xbf16>
    %39 = vector.shape_cast %36 : vector<8x16xbf16> to vector<1x8x16xbf16>
    tpu.vector_store %arg19[%c0_13, %c0_14, %c0_15], %39 {strides = array<i32>} : memref<4x8x16xbf16, #tpu.memory_space<vmem>>, vector<1x8x16xbf16>,
    %40 = vector.extract_strided_slice %35 {offsets = [0, 16], sizes = [8, 16], strides = [1, 1]} : vector<8x64xbf16> to vector<8x16xbf16>
    %c1 = arith.constant 1 : index
    %c0_16 = arith.constant 0 : index
    %c0_17 = arith.constant 0 : index
    %41 = vector.load %arg19[%c1, %c0_16, %c0_17] : memref<4x8x16xbf16, #tpu.memory_space<vmem>>, vector<1x8x16xbf16>
    %42 = vector.shape_cast %41 : vector<1x8x16xbf16> to vector<8x16xbf16>
    %43 = vector.shape_cast %40 : vector<8x16xbf16> to vector<1x8x16xbf16>
    tpu.vector_store %arg19[%c1, %c0_16, %c0_17], %43 {strides = array<i32>} : memref<4x8x16xbf16, #tpu.memory_space<vmem>>, vector<1x8x16xbf16>,
    %44 = vector.extract_strided_slice %35 {offsets = [0, 32], sizes = [8, 16], strides = [1, 1]} : vector<8x64xbf16> to vector<8x16xbf16>
    %c2 = arith.constant 2 : index
    %c0_18 = arith.constant 0 : index
    %c0_19 = arith.constant 0 : index
    %45 = vector.load %arg19[%c2, %c0_18, %c0_19] : memref<4x8x16xbf16, #tpu.memory_space<vmem>>, vector<1x8x16xbf16>
    %46 = vector.shape_cast %45 : vector<1x8x16xbf16> to vector<8x16xbf16>
    %47 = vector.shape_cast %44 : vector<8x16xbf16> to vector<1x8x16xbf16>
    tpu.vector_store %arg19[%c2, %c0_18, %c0_19], %47 {strides = array<i32>} : memref<4x8x16xbf16, #tpu.memory_space<vmem>>, vector<1x8x16xbf16>,
    %48 = vector.extract_strided_slice %35 {offsets = [0, 48], sizes = [8, 16], strides = [1, 1]} : vector<8x64xbf16> to vector<8x16xbf16>
    %c3 = arith.constant 3 : index
    %c0_20 = arith.constant 0 : index
    %c0_21 = arith.constant 0 : index
    %49 = vector.load %arg19[%c3, %c0_20, %c0_21] : memref<4x8x16xbf16, #tpu.memory_space<vmem>>, vector<1x8x16xbf16>
    %50 = vector.shape_cast %49 : vector<1x8x16xbf16> to vector<8x16xbf16>
    %51 = vector.shape_cast %48 : vector<8x16xbf16> to vector<1x8x16xbf16>
    tpu.vector_store %arg19[%c3, %c0_20, %c0_21], %51 {strides = array<i32>} : memref<4x8x16xbf16, #tpu.memory_space<vmem>>, vector<1x8x16xbf16>,
    %c0_22 = arith.constant 0 : index
    %c0_23 = arith.constant 0 : index
    %c0_24 = arith.constant 0 : index
    %52 = vector.load %arg19[%c0_22, %c0_23, %c0_24] : memref<4x8x16xbf16, #tpu.memory_space<vmem>>, vector<4x8x16xbf16>
    %c0_25 = arith.constant 0 : index
    %c0_26 = arith.constant 0 : index
    %c0_27 = arith.constant 0 : index
    %53 = vector.load %arg17[%c0_25, %c0_26, %c0_27] : memref<4x8x16xbf16, #tpu.memory_space<vmem>>, vector<4x8x16xbf16>
    %c0_28 = arith.constant 0 : index
    %c0_29 = arith.constant 0 : index
    %c0_30 = arith.constant 0 : index
    %54 = vector.load %arg18[%c0_28, %c0_29, %c0_30] : memref<4x8x16xbf16, #tpu.memory_space<vmem>>, vector<4x8x16xbf16>
    "tpu.trace_start"() <{level = 10 : i32, message = "hqd,hkd->hqk"}> : () -> ()
    %cst_31 = arith.constant dense<0.000000e+00> : vector<4x8x8xf32>
    %55 = tpu.matmul %52, %53, %cst_31 {dimension_numbers = #tpu.dot_dimension_numbers<[2], [2], [1], [1], [0, 0, 0, 1, 1, 1], [0], [0]>} : vector<4x8x16xbf16>, vector<4x8x16xbf16>, vector<4x8x8xf32> -> vector<4x8x8xf32>
    "tpu.trace_stop"() : () -> ()
    %cst_32 = arith.constant dense<0xFF800000> : vector<4x8xf32>
    %56 = vector.multi_reduction <maximumf>, %55, %cst_32 [2] : vector<4x8x8xf32> to vector<4x8xf32>
    %57 = vector.shape_cast %56 : vector<4x8xf32> to vector<4x8x1xf32>
    %58 = vector.broadcast %57 : vector<4x8x1xf32> to vector<4x8x8xf32>
    %59 = arith.subf %55, %58 : vector<4x8x8xf32>
    %60 = math.exp %59 : vector<4x8x8xf32>
    %cst_33 = arith.constant dense<0.000000e+00> : vector<4x8xf32>
    %61 = vector.multi_reduction <add>, %60, %cst_33 [2] : vector<4x8x8xf32> to vector<4x8xf32>
    %62 = vector.shape_cast %61 : vector<4x8xf32> to vector<4x8x1xf32>
    %63 = tpu.reciprocal %62 {approx = true} : vector<4x8x1xf32> -> vector<4x8x1xf32>
    %64 = vector.broadcast %63 : vector<4x8x1xf32> to vector<4x8x8xf32>
    %65 = arith.mulf %60, %64 : vector<4x8x8xf32>
    %66 = arith.truncf %65 : vector<4x8x8xf32> to vector<4x8x8xbf16>
    "tpu.trace_start"() <{level = 10 : i32, message = "hqk,hkd->hqd"}> : () -> ()
    %cst_34 = arith.constant dense<0.000000e+00> : vector<4x8x16xf32>
    %67 = tpu.matmul %66, %54, %cst_34 {dimension_numbers = #tpu.dot_dimension_numbers<[2], [1], [1], [2], [0, 0, 0, 1, 1, 2], [0], [0]>} : vector<4x8x8xbf16>, vector<4x8x16xbf16>, vector<4x8x16xf32> -> vector<4x8x16xf32>
    "tpu.trace_stop"() : () -> ()
    %68 = arith.truncf %67 : vector<4x8x16xf32> to vector<4x8x16xbf16>
    %69 = vector.extract_strided_slice %68 {offsets = [0, 0, 0], sizes = [1, 8, 16], strides = [1, 1, 1]} : vector<4x8x16xbf16> to vector<1x8x16xbf16>
    %70 = vector.shape_cast %69 : vector<1x8x16xbf16> to vector<8x16xbf16>
    %71 = vector.extract_strided_slice %68 {offsets = [1, 0, 0], sizes = [1, 8, 16], strides = [1, 1, 1]} : vector<4x8x16xbf16> to vector<1x8x16xbf16>
    %72 = vector.shape_cast %71 : vector<1x8x16xbf16> to vector<8x16xbf16>
    %73 = vector.extract_strided_slice %68 {offsets = [2, 0, 0], sizes = [1, 8, 16], strides = [1, 1, 1]} : vector<4x8x16xbf16> to vector<1x8x16xbf16>
    %74 = vector.shape_cast %73 : vector<1x8x16xbf16> to vector<8x16xbf16>
    %75 = vector.extract_strided_slice %68 {offsets = [3, 0, 0], sizes = [1, 8, 16], strides = [1, 1, 1]} : vector<4x8x16xbf16> to vector<1x8x16xbf16>
    %76 = vector.shape_cast %75 : vector<1x8x16xbf16> to vector<8x16xbf16>
    %77 = tpu.concatenate %70, %72, %74, %76 in 1 : vector<8x16xbf16>, vector<8x16xbf16>, vector<8x16xbf16>, vector<8x16xbf16> -> vector<8x64xbf16>
    %c0_35 = arith.constant 0 : index
    %c0_36 = arith.constant 0 : index
    %78 = vector.load %arg8[%c0_35, %c0_36] : memref<64x32xbf16, #tpu.memory_space<vmem>>, vector<64x32xbf16>
    %cst_37 = arith.constant dense<0.000000e+00> : vector<8x32xf32>
    %79 = tpu.matmul %77, %78, %cst_37 {dimension_numbers = #tpu.dot_dimension_numbers<[1], [0], [0], [1], [0, 0, 1, 1], [], []>} : vector<8x64xbf16>, vector<64x32xbf16>, vector<8x32xf32> -> vector<8x32xf32>
    %c0_38 = arith.constant 0 : index
    %c0_39 = arith.constant 0 : index
    %80 = vector.load %arg9[%c0_38, %c0_39] : memref<1x32xf32, #tpu.memory_space<vmem>>, vector<1x32xf32>
    %81 = vector.broadcast %80 : vector<1x32xf32> to vector<8x32xf32>
    %82 = arith.addf %79, %81 : vector<8x32xf32>
    %83 = arith.addf %82, %7 : vector<8x32xf32>
    %c0_40 = arith.constant 0 : index
    %c0_41 = arith.constant 0 : index
    %84 = vector.load %arg10[%c0_40, %c0_41] : memref<1x32xf32, #tpu.memory_space<vmem>>, vector<1x32xf32>
    %c0_42 = arith.constant 0 : index
    %c0_43 = arith.constant 0 : index
    %85 = vector.load %arg11[%c0_42, %c0_43] : memref<1x32xf32, #tpu.memory_space<vmem>>, vector<1x32xf32>
    %cst_44 = arith.constant dense<0.000000e+00> : vector<8xf32>
    %86 = vector.multi_reduction <add>, %83, %cst_44 [1] : vector<8x32xf32> to vector<8xf32>
    %87 = vector.shape_cast %86 : vector<8xf32> to vector<8x1xf32>
    %cst_45 = arith.constant 3.200000e+01 : f32
    %88 = vector.broadcast %cst_45 : f32 to vector<8x1xf32>
    %89 = arith.divf %87, %88 : vector<8x1xf32>
    %90 = vector.broadcast %89 : vector<8x1xf32> to vector<8x32xf32>
    %91 = arith.subf %83, %90 : vector<8x32xf32>
    %92 = arith.mulf %91, %91 : vector<8x32xf32>
    %cst_46 = arith.constant dense<0.000000e+00> : vector<8xf32>
    %93 = vector.multi_reduction <add>, %92, %cst_46 [1] : vector<8x32xf32> to vector<8xf32>
    %94 = vector.shape_cast %93 : vector<8xf32> to vector<8x1xf32>
    %cst_47 = arith.constant 3.200000e+01 : f32
    %95 = vector.broadcast %cst_47 : f32 to vector<8x1xf32>
    %96 = arith.divf %94, %95 : vector<8x1xf32>
    %97 = vector.broadcast %89 : vector<8x1xf32> to vector<8x32xf32>
    %98 = arith.subf %83, %97 : vector<8x32xf32>
    %cst_48 = arith.constant 9.99999974E-6 : f32
    %99 = vector.broadcast %cst_48 : f32 to vector<8x1xf32>
    %100 = arith.addf %96, %99 : vector<8x1xf32>
    %101 = math.rsqrt %100 : vector<8x1xf32>
    %102 = vector.broadcast %101 : vector<8x1xf32> to vector<8x32xf32>
    %103 = arith.mulf %98, %102 : vector<8x32xf32>
    %104 = vector.broadcast %84 : vector<1x32xf32> to vector<8x32xf32>
    %105 = arith.mulf %103, %104 : vector<8x32xf32>
    %106 = vector.broadcast %85 : vector<1x32xf32> to vector<8x32xf32>
    %107 = arith.addf %105, %106 : vector<8x32xf32>
    %108 = arith.truncf %107 : vector<8x32xf32> to vector<8x32xbf16>
    %c0_49 = arith.constant 0 : index
    %c0_50 = arith.constant 0 : index
    %109 = vector.load %arg12[%c0_49, %c0_50] : memref<32x64xbf16, #tpu.memory_space<vmem>>, vector<32x64xbf16>
    %cst_51 = arith.constant dense<0.000000e+00> : vector<8x64xf32>
    %110 = tpu.matmul %108, %109, %cst_51 {dimension_numbers = #tpu.dot_dimension_numbers<[1], [0], [0], [1], [0, 0, 1, 1], [], []>} : vector<8x32xbf16>, vector<32x64xbf16>, vector<8x64xf32> -> vector<8x64xf32>
    %c0_52 = arith.constant 0 : index
    %c0_53 = arith.constant 0 : index
    %111 = vector.load %arg13[%c0_52, %c0_53] : memref<1x64xf32, #tpu.memory_space<vmem>>, vector<1x64xf32>
    %112 = vector.broadcast %111 : vector<1x64xf32> to vector<8x64xf32>
    %113 = arith.addf %110, %112 : vector<8x64xf32>
    %cst_54 = arith.constant 5.000000e-01 : f32
    %114 = vector.broadcast %cst_54 : f32 to vector<8x64xf32>
    %115 = arith.mulf %114, %113 : vector<8x64xf32>
    %cst_55 = arith.constant 0.707106769 : f32
    %116 = vector.broadcast %cst_55 : f32 to vector<8x64xf32>
    %117 = arith.mulf %113, %116 : vector<8x64xf32>
    %118 = math.erf %117 : vector<8x64xf32>
    %cst_56 = arith.constant 1.000000e+00 : f32
    %119 = vector.broadcast %cst_56 : f32 to vector<8x64xf32>
    %120 = arith.addf %119, %118 : vector<8x64xf32>
    %121 = arith.mulf %115, %120 : vector<8x64xf32>
    %122 = arith.truncf %121 : vector<8x64xf32> to vector<8x64xbf16>
    %c0_57 = arith.constant 0 : index
    %c0_58 = arith.constant 0 : index
    %123 = vector.load %arg14[%c0_57, %c0_58] : memref<64x32xbf16, #tpu.memory_space<vmem>>, vector<64x32xbf16>
    %cst_59 = arith.constant dense<0.000000e+00> : vector<8x32xf32>
    %124 = tpu.matmul %122, %123, %cst_59 {dimension_numbers = #tpu.dot_dimension_numbers<[1], [0], [0], [1], [0, 0, 1, 1], [], []>} : vector<8x64xbf16>, vector<64x32xbf16>, vector<8x32xf32> -> vector<8x32xf32>
    %c0_60 = arith.constant 0 : index
    %c0_61 = arith.constant 0 : index
    %125 = vector.load %arg15[%c0_60, %c0_61] : memref<1x32xf32, #tpu.memory_space<vmem>>, vector<1x32xf32>
    %126 = vector.broadcast %125 : vector<1x32xf32> to vector<8x32xf32>
    %127 = arith.addf %124, %126 : vector<8x32xf32>
    %128 = arith.addf %127, %83 : vector<8x32xf32>
    %c0_62 = arith.constant 0 : index
    %c0_63 = arith.constant 0 : index
    %c0_64 = arith.constant 0 : index
    %129 = vector.load %arg16[%c0_62, %c0_63, %c0_64] : memref<1x8x32xf32, #tpu.memory_space<vmem>>, vector<1x8x32xf32>
    %130 = vector.shape_cast %129 : vector<1x8x32xf32> to vector<8x32xf32>
    %131 = vector.shape_cast %128 : vector<8x32xf32> to vector<1x8x32xf32>
    tpu.vector_store %arg16[%c0_62, %c0_63, %c0_64], %131 {strides = array<i32>} : memref<1x8x32xf32, #tpu.memory_space<vmem>>, vector<1x8x32xf32>,
    return
  }
  func.func @transform_0(%arg0: i32, %arg1: i32) -> (i32, i32, i32) {
    %c0_i32 = arith.constant 0 : i32
    %c0_i32_0 = arith.constant 0 : i32
    %c0_i32_1 = arith.constant 0 : i32
    return %arg0, %c0_i32, %c0_i32_0 : i32, i32, i32
  }
  func.func @transform_1(%arg0: i32, %arg1: i32) -> (i32, i32) {
    %c0_i32 = arith.constant 0 : i32
    %c0_i32_0 = arith.constant 0 : i32
    %c0_i32_1 = arith.constant 0 : i32
    return %c0_i32, %c0_i32_0 : i32, i32
  }
  func.func @transform_2(%arg0: i32, %arg1: i32) -> (i32, i32) {
    %c0_i32 = arith.constant 0 : i32
    %c0_i32_0 = arith.constant 0 : i32
    %c0_i32_1 = arith.constant 0 : i32
    return %c0_i32, %c0_i32_0 : i32, i32
  }
  func.func @transform_3(%arg0: i32, %arg1: i32) -> (i32, i32) {
    %c0_i32 = arith.constant 0 : i32
    %c0_i32_0 = arith.constant 0 : i32
    %c0_i32_1 = arith.constant 0 : i32
    return %c0_i32, %c0_i32_0 : i32, i32
  }
  func.func @transform_4(%arg0: i32, %arg1: i32) -> (i32, i32) {
    %c0_i32 = arith.constant 0 : i32
    %c0_i32_0 = arith.constant 0 : i32
    %c0_i32_1 = arith.constant 0 : i32
    return %c0_i32, %c0_i32_0 : i32, i32
  }
  func.func @transform_5(%arg0: i32, %arg1: i32) -> (i32, i32) {
    %c0_i32 = arith.constant 0 : i32
    %c0_i32_0 = arith.constant 0 : i32
    %c0_i32_1 = arith.constant 0 : i32
    return %c0_i32, %c0_i32_0 : i32, i32
  }
  func.func @transform_6(%arg0: i32, %arg1: i32) -> (i32, i32) {
    %c0_i32 = arith.constant 0 : i32
    %c0_i32_0 = arith.constant 0 : i32
    %c0_i32_1 = arith.constant 0 : i32
    return %c0_i32, %c0_i32_0 : i32, i32
  }
  func.func @transform_7(%arg0: i32, %arg1: i32) -> (i32, i32) {
    %c0_i32 = arith.constant 0 : i32
    %c0_i32_0 = arith.constant 0 : i32
    %c0_i32_1 = arith.constant 0 : i32
    return %c0_i32, %c0_i32_0 : i32, i32
  }
  func.func @transform_8(%arg0: i32, %arg1: i32) -> (i32, i32) {
    %c0_i32 = arith.constant 0 : i32
    %c0_i32_0 = arith.constant 0 : i32
    %c0_i32_1 = arith.constant 0 : i32
    return %c0_i32, %c0_i32_0 : i32, i32
  }
  func.func @transform_9(%arg0: i32, %arg1: i32) -> (i32, i32) {
    %c0_i32 = arith.constant 0 : i32
    %c0_i32_0 = arith.constant 0 : i32
    %c0_i32_1 = arith.constant 0 : i32
    return %c0_i32, %c0_i32_0 : i32, i32
  }
  func.func @transform_10(%arg0: i32, %arg1: i32) -> (i32, i32) {
    %c0_i32 = arith.constant 0 : i32
    %c0_i32_0 = arith.constant 0 : i32
    %c0_i32_1 = arith.constant 0 : i32
    return %c0_i32, %c0_i32_0 : i32, i32
  }
  func.func @transform_11(%arg0: i32, %arg1: i32) -> (i32, i32) {
    %c0_i32 = arith.constant 0 : i32
    %c0_i32_0 = arith.constant 0 : i32
    %c0_i32_1 = arith.constant 0 : i32
    return %c0_i32, %c0_i32_0 : i32, i32
  }
  func.func @transform_12(%arg0: i32, %arg1: i32) -> (i32, i32) {
    %c0_i32 = arith.constant 0 : i32
    %c0_i32_0 = arith.constant 0 : i32
    %c0_i32_1 = arith.constant 0 : i32
    return %c0_i32, %c0_i32_0 : i32, i32
  }
  func.func @transform_13(%arg0: i32, %arg1: i32) -> (i32, i32) {
    %c0_i32 = arith.constant 0 : i32
    %c0_i32_0 = arith.constant 0 : i32
    %c0_i32_1 = arith.constant 0 : i32
    return %c0_i32, %c0_i32_0 : i32, i32
  }
  func.func @transform_14(%arg0: i32, %arg1: i32) -> (i32, i32, i32) {
    %c0_i32 = arith.constant 0 : i32
    %c0_i32_0 = arith.constant 0 : i32
    return %arg0, %arg1, %c0_i32 : i32, i32, i32
  }
}

</mosaic_0001>

<bundles_post_ra>
// kernel: tpu_custom_call.1
= control target key start
LH: loop header
LB: loop body
LE: loop exit
PB: predicated region body
PF: predicated region fallthrough
CT: control target
= control target key end

     0   :  { %s3612_s0 = inlined_call_operand.hbm [shape: f32[2,8,32], index: 0, kind: input, shape index: {}]   ;;  %s3613_s1 = inlined_call_operand.hbm [shape: f32[1,32], index: 1, kind: input, shape index: {}]   ;;  %s3614_s2 = inlined_call_operand.hbm [shape: f32[1,32], index: 2, kind: input, shape index: {}]   ;;  %s3615_s3 = inlined_call_operand.hbm [shape: bf16[32,64], index: 3, kind: input, shape index: {}]   ;;  %s3616_s4 = inlined_call_operand.hbm [shape: bf16[32,64], index: 4, kind: input, shape index: {}]   ;;  %s3617_s5 = inlined_call_operand.hbm [shape: bf16[32,64], index: 5, kind: input, shape index: {}]   ;;  %s3618_s6 = inlined_call_operand.hbm [shape: bf16[64,32], index: 6, kind: input, shape index: {}]   ;;  %s3619_s7 = inlined_call_operand.hbm [shape: f32[1,32], index: 7, kind: input, shape index: {}]   ;;  %s3620_s8 = inlined_call_operand.hbm [shape: f32[1,32], index: 8, kind: input, shape index: {}]   ;;  %s3621_s9 = inlined_call_operand.hbm [shape: f32[1,32], index: 9, kind: input, shape index: {}]   ;;  %s3622_s10 = inlined_call_operand.hbm [shape: bf16[32,64], index: 10, kind: input, shape index: {}]   ;;  %s3623_s11 = inlined_call_operand.hbm [shape: f32[1,64], index: 11, kind: input, shape index: {}]   ;;  %s3624_s12 = inlined_call_operand.hbm [shape: bf16[64,32], index: 12, kind: input, shape index: {}]   ;;  %s3625_s13 = inlined_call_operand.hbm [shape: f32[1,32], index: 13, kind: input, shape index: {}]   ;;  %s3626_s14 = inlined_call_operand.hbm [shape: f32[2,8,32], index: 14, kind: output, shape index: {}]  }
   0x1   :  { %3638 = sst [smem:[#allocation43_spill]] %s3612_s0 }
   0x2   :  { %3639 = sst [smem:[#allocation44_spill]] %s3613_s1 }
   0x3   :  { %3640 = sst [smem:[#allocation45_spill]] %s3614_s2 }
   0x4   :  { %3641 = sst [smem:[#allocation46_spill]] %s3615_s3 }
   0x5   :  { %3642 = sst [smem:[#allocation47_spill]] %s3626_s14 }
   0x6   :  { %19 = vsyncpa [#allocation6], 0 }
   0x7   :  { %21 = vsyncpa [#allocation6 + $0x1], 0 }
   0x8   :  { %22 = vsyncpa [#allocation9], 0 }
   0x9   :  { %23 = vsyncpa [#allocation12], 0 }
   0xa   :  { %24 = vsyncpa [#allocation15], 0 }
   0xb   :  { %25 = vsyncpa [#allocation18], 0 }
   0xc   :  { %26 = vsyncpa [#allocation21], 0 }
   0xd   :  { %27 = vsyncpa [#allocation24], 0 }
   0xe   :  { %28 = vsyncpa [#allocation27], 0 }
   0xf   :  { %29 = vsyncpa [#allocation7], 0 }
  0x10   :  { %31 = vsyncpa [#allocation7 + $0x1], 0  ;;  %s2997_s29 = smov 0   ;;  %s2999_s30 = smov 0  }
  0x11   :  { %s3001_s15 = smov 0   ;;  %s3003_s16 = smov 0  }
  0x12   :  { %s3005_s17 = smov 0   ;;  %s3007_s18 = smov 0  }
  0x13 LB: > { %3643 = sst [smem:[#allocation38_spill]] %s2875_s29  ;;  %s3627_s19 = sadd.s32 4294967295, %s2895_s18   ;;  %s2895_s18 = sphi %s3007_s18, %s37_s18   ;;  %s2891_s17 = sphi %s3005_s17, %s3681_s17   ;;  %s2887_s16 = sphi %s3003_s16, %s3680_s16   ;;  %s2883_s15 = sphi %s3001_s15, %s3679_s15   ;;  %s2879_s30 = sphi %s2999_s30, %s3678_s30   ;;  %s2875_s29 = sphi %s2997_s29, %s3677_s29  }
  0x14   : > { %3644 = sst [smem:[#allocation39_spill]] %s2879_s30  ;;  %p1924_p0 = scmp.ge.s32.totalorder %s2895_s18, 1 }
  0x15   : > { %3645 = sst [smem:[#allocation40_spill]] %s2887_s16  ;;  %p3031_p1 = scmp.eq.s32.totalorder %s3627_s19, 0 }
  0x16   : > { %p381_p2 = scmp.lt.s32.totalorder %s2895_s18, 3  ;;  %s2897_s22 = smov [#allocation8]  }
  0x17   : > { %s3646_s20 = scalar_select %p3031_p1, 1, 0 }
  0x18   : > { %p3036_p3 = pnand %p1924_p0, %p381_p2  ;;  %s394_s23 = sshll.u32 %s2897_s22, 4  ;;  %s395_s23 = int_to_ptr.vmem [resolvable:$true] %s394_s23 }
  0x19   : > { %3647 = sst [smem:[#allocation41_spill]] %s3646_s20  ;;  %s2898_s24 = smov [#allocation11]  }
  0x1a   : > { %s3648_s21 = scalar_select %p3036_p3, 1, 0 }
  0x1b   : > { %p2204_p5 = pneg %p3036_p3  ;;  %s415_s25 = sshll.u32 %s2898_s24, 4  ;;  %s3049_s25 = int_to_ptr.vmem [resolvable:$true] %s415_s25 }
  0x1c   : > { %3649 = sst [smem:[#allocation42_spill]] %s3648_s21  ;;  %s2899_s27 = smov [#allocation14]  }
  0x1d   : > { %p3045_p6 = pnand %p2204_p5, %p3031_p1  ;;  %s3051_s28 = sshll.u32 %s2899_s27, 4  ;;  %s442_s28 = int_to_ptr.vmem [resolvable:$true] %s3051_s28 }
  0x1e   : > { %s3651_s1 = sld [smem:[#allocation44_spill]] }
  0x1f   : > { %p3061_p8 = pneg %p3045_p6 }
  0x24   : > { %s2391_s22 = scalar_lea.hbm %s3651_s1, 16 }
  0x25   : > { %p2392_p7 = scmp.ne.s32.totalorder %s3651_s1, %s2391_s22  ;;  %p2398_p11 = scmp.lt.u32.totalorder %s2391_s22, %s3651_s1 }
  0x27   : > { %p2394_p9 = pnand %p3061_p8, %p2392_p7 }
  0x29   : > { %p2395_p10 = pneg %p2394_p9 }
  0x2b   : > { %p2400_p12 = pnand %p2398_p11, %p2395_p10 }
  0x2d   : > { %2403 = shalt.err (!%p2400_p12)
}
  0x2e   : > { %s2404_s14 = scalar_lea.vmem %s395_s23, 16  ;;  %s2411_s16 = scalar_lea.vmem %s395_s23, 32 }
  0x2f   : > { %p2405_p13 = scmp.ne.s32.totalorder %s395_s23, %s2404_s14  ;;  %p2412_p5 = scmp.lt.s32.totalorder %s395_s23, %s395_s23 }
  0x30   : > { %p2413_p4 = scmp.lt.s32.totalorder %s2411_s16, %s2404_s14 }
  0x31   : > { %p2407_p0 = pnand %p2405_p13, %p3061_p8 }
  0x32   : > { %p2414_p3 = por %p2413_p4, %p2412_p5 }
  0x33   : > { %p2408_p2 = pneg %p2407_p0 }
  0x35   : > { %p2415_p1 = pnand %p2414_p3, %p2408_p2 }
  0x37   : > { %2418 = shalt.err (!%p2415_p1)
}
  0x38   : > { %2207 = dma.hbm_to_vmem [thread:$0]  (!%p3045_p6), %s3651_s1, 16, %s395_s23, [#allocation9]  }
  0x39   : > { %s3653_s3 = sld [smem:[#allocation46_spill]] }
  0x3f   : > { %s2419_s27 = scalar_lea.hbm %s3653_s3, 256 }
  0x40   : > { %p2420_p7 = scmp.ne.s32.totalorder %s3653_s3, %s2419_s27  ;;  %p2426_p1 = scmp.lt.u32.totalorder %s2419_s27, %s3653_s3 }
  0x42   : > { %p2422_p9 = pnand %p2420_p7, %p3061_p8 }
  0x44   : > { %p2423_p4 = pneg %p2422_p9 }
  0x46   : > { %p2428_p3 = pnand %p2426_p1, %p2423_p4 }
  0x48   : > { %2431 = shalt.err (!%p2428_p3)
}
  0x49   : > { %s2432_s23 = scalar_lea.vmem %s3049_s25, 256  ;;  %p2440_p13 = scmp.lt.s32.totalorder %s3049_s25, %s3049_s25 }
  0x4a   : > { %p2433_p10 = scmp.ne.s32.totalorder %s3049_s25, %s2432_s23  ;;  %p2441_p0 = scmp.lt.s32.totalorder %s2432_s23, %s2432_s23 }
  0x4c   : > { %p2435_p11 = pnand %p2433_p10, %p3061_p8  ;;  %p2442_p2 = por %p2441_p0, %p2440_p13 }
  0x4e   : > { %p2436_p12 = pneg %p2435_p11 }
  0x50   : > { %p2443_p5 = pnand %p2442_p2, %p2436_p12 }
  0x52   : > { %2446 = shalt.err (!%p2443_p5)
}
  0x53   : > { %s2900_s29 = smov 64   ;;  %s2901_s20 = smov 4  }
  0x54   : > { %2213 = dma.hbm_to_vmem [thread:$0]  (!%p3045_p6), %s3653_s3, 256, %s3049_s25, [#allocation12], %s2900_s29, %s2900_s29, %s2901_s20  }
  0x55   : > { %s2447_s27 = scalar_lea.hbm %s3617_s5, 256 }
  0x56   : > { %p2448_p7 = scmp.ne.s32.totalorder %s3617_s5, %s2447_s27  ;;  %p2454_p1 = scmp.lt.u32.totalorder %s2447_s27, %s3617_s5 }
  0x58   : > { %p2450_p9 = pnand %p2448_p7, %p3061_p8 }
  0x5a   : > { %p2451_p4 = pneg %p2450_p9 }
  0x5c   : > { %p2456_p3 = pnand %p2454_p1, %p2451_p4 }
  0x5e   : > { %2459 = shalt.err (!%p2456_p3)
}
  0x5f   : > { %s2460_s19 = scalar_lea.vmem %s442_s28, 256  ;;  %p2468_p13 = scmp.lt.s32.totalorder %s442_s28, %s442_s28 }
  0x60   : > { %p2461_p10 = scmp.ne.s32.totalorder %s442_s28, %s2460_s19  ;;  %p2469_p0 = scmp.lt.s32.totalorder %s2460_s19, %s2460_s19 }
  0x62   : > { %p2463_p11 = pnand %p2461_p10, %p3061_p8  ;;  %p2470_p2 = por %p2469_p0, %p2468_p13 }
  0x64   : > { %p2464_p12 = pneg %p2463_p11 }
  0x66   : > { %p2471_p5 = pnand %p2470_p2, %p2464_p12 }
  0x68   : > { %2474 = shalt.err (!%p2471_p5)
}
  0x69   : > { %2219 = dma.hbm_to_vmem [thread:$0]  (!%p3045_p6), %s3617_s5, 256, %s442_s28, [#allocation15], %s2900_s29, %s2900_s29, %s2901_s20  }
  0x6a   : > { %s2902_s21 = smov [#allocation17]   ;;  %s2903_s22 = smov [#allocation20]  }
  0x6b   : > { %s468_s0 = sshll.u32 %s2902_s21, 4  ;;  %s490_s27 = sshll.u32 %s2903_s22, 4  ;;  %s469_s0 = int_to_ptr.vmem [resolvable:$true] %s468_s0  ;;  %s491_s27 = int_to_ptr.vmem [resolvable:$true] %s490_s27 }
  0x6c   : > { %s2475_s23 = scalar_lea.hbm %s3619_s7, 16 }
  0x6d   : > { %p2476_p7 = scmp.ne.s32.totalorder %s3619_s7, %s2475_s23  ;;  %p2482_p1 = scmp.lt.u32.totalorder %s2475_s23, %s3619_s7 }
  0x6f   : > { %p2478_p9 = pnand %p2476_p7, %p3061_p8 }
  0x71   : > { %p2479_p4 = pneg %p2478_p9 }
  0x73   : > { %p2484_p3 = pnand %p2482_p1, %p2479_p4 }
  0x75   : > { %2487 = shalt.err (!%p2484_p3)
}
  0x76   : > { %s2488_s28 = scalar_lea.vmem %s469_s0, 16  ;;  %s2495_s25 = scalar_lea.vmem %s469_s0, 32 }
  0x77   : > { %p2489_p10 = scmp.ne.s32.totalorder %s469_s0, %s2488_s28  ;;  %p2496_p13 = scmp.lt.s32.totalorder %s469_s0, %s469_s0 }
  0x78   : > { %p2497_p0 = scmp.lt.s32.totalorder %s2495_s25, %s2488_s28 }
  0x79   : > { %p2491_p11 = pnand %p2489_p10, %p3061_p8 }
  0x7a   : > { %p2498_p2 = por %p2497_p0, %p2496_p13 }
  0x7b   : > { %p2492_p12 = pneg %p2491_p11 }
  0x7d   : > { %p2499_p5 = pnand %p2498_p2, %p2492_p12 }
  0x7f   : > { %2502 = shalt.err (!%p2499_p5)
}
  0x80   : > { %2225 = dma.hbm_to_vmem [thread:$0]  (!%p3045_p6), %s3619_s7, 16, %s469_s0, [#allocation18]  }
  0x81   : > { %s2503_s14 = scalar_lea.hbm %s3621_s9, 16 }
  0x82   : > { %p2504_p7 = scmp.ne.s32.totalorder %s3621_s9, %s2503_s14  ;;  %p2510_p1 = scmp.lt.u32.totalorder %s2503_s14, %s3621_s9 }
  0x84   : > { %p2506_p9 = pnand %p2504_p7, %p3061_p8 }
  0x86   : > { %p2507_p4 = pneg %p2506_p9 }
  0x88   : > { %p2512_p3 = pnand %p2510_p1, %p2507_p4 }
  0x8a   : > { %2515 = shalt.err (!%p2512_p3)
}
  0x8b   : > { %s2516_s28 = scalar_lea.vmem %s491_s27, 16  ;;  %s2523_s0 = scalar_lea.vmem %s491_s27, 32 }
  0x8c   : > { %p2517_p10 = scmp.ne.s32.totalorder %s491_s27, %s2516_s28  ;;  %p2524_p13 = scmp.lt.s32.totalorder %s491_s27, %s491_s27 }
  0x8d   : > { %p2525_p0 = scmp.lt.s32.totalorder %s2523_s0, %s2516_s28 }
  0x8e   : > { %p2519_p11 = pnand %p2517_p10, %p3061_p8 }
  0x8f   : > { %p2526_p2 = por %p2525_p0, %p2524_p13 }
  0x90   : > { %p2520_p12 = pneg %p2519_p11 }
  0x92   : > { %p2527_p5 = pnand %p2526_p2, %p2520_p12 }
  0x94   : > { %2530 = shalt.err (!%p2527_p5)
}
  0x95   : > { %2231 = dma.hbm_to_vmem [thread:$0]  (!%p3045_p6), %s3621_s9, 16, %s491_s27, [#allocation21]  }
  0x96   : > { %s2904_s21 = smov [#allocation23]   ;;  %s2905_s22 = smov [#allocation10]  }
  0x97   : > { %s514_s30 = sshll.u32 %s2904_s21, 4  ;;  %s405_s14 = sshll.u32 %s2905_s22, 4  ;;  %s515_s30 = int_to_ptr.vmem [resolvable:$true] %s514_s30  ;;  %s406_s14 = int_to_ptr.vmem [resolvable:$true] %s405_s14 }
  0x98   : > { %s2531_s19 = scalar_lea.hbm %s3623_s11, 16 }
  0x99   : > { %p2532_p7 = scmp.ne.s32.totalorder %s3623_s11, %s2531_s19  ;;  %p2538_p1 = scmp.lt.u32.totalorder %s2531_s19, %s3623_s11 }
  0x9b   : > { %p2534_p9 = pnand %p2532_p7, %p3061_p8 }
  0x9d   : > { %p2535_p4 = pneg %p2534_p9 }
  0x9f   : > { %p2540_p3 = pnand %p2538_p1, %p2535_p4 }
  0xa1   : > { %2543 = shalt.err (!%p2540_p3)
}
  0xa2   : > { %s2544_s27 = scalar_lea.vmem %s515_s30, 16  ;;  %s2551_s3 = scalar_lea.vmem %s515_s30, 32 }
  0xa3   : > { %p2545_p10 = scmp.ne.s32.totalorder %s515_s30, %s2544_s27  ;;  %p2552_p13 = scmp.lt.s32.totalorder %s515_s30, %s515_s30 }
  0xa4   : > { %p2553_p0 = scmp.lt.s32.totalorder %s2551_s3, %s2544_s27 }
  0xa5   : > { %p2547_p11 = pnand %p2545_p10, %p3061_p8 }
  0xa6   : > { %p2554_p2 = por %p2553_p0, %p2552_p13 }
  0xa7   : > { %p2548_p12 = pneg %p2547_p11 }
  0xa9   : > { %p2555_p5 = pnand %p2554_p2, %p2548_p12 }
  0xab   : > { %2558 = shalt.err (!%p2555_p5)
}
  0xac   : > { %2237 = dma.hbm_to_vmem [thread:$0]  (!%p3045_p6), %s3623_s11, 16, %s515_s30, [#allocation24]  }
  0xad   : > { %s3654_s2 = sld [smem:[#allocation45_spill]] }
  0xb3   : > { %s2559_s19 = scalar_lea.hbm %s3654_s2, 16 }
  0xb4   : > { %p2560_p7 = scmp.ne.s32.totalorder %s3654_s2, %s2559_s19  ;;  %p2566_p1 = scmp.lt.u32.totalorder %s2559_s19, %s3654_s2 }
  0xb6   : > { %p2562_p9 = pnand %p2560_p7, %p3061_p8 }
  0xb8   : > { %p2563_p4 = pneg %p2562_p9 }
  0xba   : > { %p2568_p3 = pnand %p2566_p1, %p2563_p4 }
  0xbc   : > { %2571 = shalt.err (!%p2568_p3)
}
  0xbd   : > { %s2572_s27 = scalar_lea.vmem %s406_s14, 16  ;;  %s2579_s30 = scalar_lea.vmem %s406_s14, 32 }
  0xbe   : > { %p2573_p10 = scmp.ne.s32.totalorder %s406_s14, %s2572_s27  ;;  %p2580_p13 = scmp.lt.s32.totalorder %s406_s14, %s406_s14 }
  0xbf   : > { %p2581_p0 = scmp.lt.s32.totalorder %s2579_s30, %s2572_s27 }
  0xc0   : > { %p2575_p11 = pnand %p2573_p10, %p3061_p8 }
  0xc1   : > { %p2582_p2 = por %p2581_p0, %p2580_p13 }
  0xc2   : > { %p2576_p12 = pneg %p2575_p11 }
  0xc4   : > { %p2583_p5 = pnand %p2582_p2, %p2576_p12 }
  0xc6   : > { %2586 = shalt.err (!%p2583_p5)
}
  0xc7   : > { %2210 = dma.hbm_to_vmem [thread:$0]  (!%p3045_p6), %s3654_s2, 16, %s406_s14, [#allocation9]  }
  0xc8   : > { %s2906_s22 = smov [#allocation13]   ;;  %s2907_s23 = smov [#allocation16]  }
  0xc9   : > { %s428_s16 = sshll.u32 %s2906_s22, 4  ;;  %s454_s19 = sshll.u32 %s2907_s23, 4  ;;  %s429_s16 = int_to_ptr.vmem [resolvable:$true] %s428_s16  ;;  %s455_s19 = int_to_ptr.vmem [resolvable:$true] %s454_s19 }
  0xca   : > { %s2587_s0 = scalar_lea.hbm %s3616_s4, 256 }
  0xcb   : > { %p2588_p7 = scmp.ne.s32.totalorder %s3616_s4, %s2587_s0  ;;  %p2594_p1 = scmp.lt.u32.totalorder %s2587_s0, %s3616_s4 }
  0xcd   : > { %p2590_p9 = pnand %p2588_p7, %p3061_p8 }
  0xcf   : > { %p2591_p4 = pneg %p2590_p9 }
  0xd1   : > { %p2596_p3 = pnand %p2594_p1, %p2591_p4 }
  0xd3   : > { %2599 = shalt.err (!%p2596_p3)
}
  0xd4   : > { %s2600_s14 = scalar_lea.vmem %s429_s16, 256  ;;  %p2608_p13 = scmp.lt.s32.totalorder %s429_s16, %s429_s16 }
  0xd5   : > { %p2601_p10 = scmp.ne.s32.totalorder %s429_s16, %s2600_s14  ;;  %p2609_p0 = scmp.lt.s32.totalorder %s2600_s14, %s2600_s14 }
  0xd7   : > { %p2603_p11 = pnand %p2601_p10, %p3061_p8  ;;  %p2610_p2 = por %p2609_p0, %p2608_p13 }
  0xd9   : > { %p2604_p12 = pneg %p2603_p11 }
  0xdb   : > { %p2611_p5 = pnand %p2610_p2, %p2604_p12 }
  0xdd   : > { %2614 = shalt.err (!%p2611_p5)
}
  0xde   : > { %2216 = dma.hbm_to_vmem [thread:$0]  (!%p3045_p6), %s3616_s4, 256, %s429_s16, [#allocation12], %s2900_s29, %s2900_s29, %s2901_s20  }
  0xdf   : > { %s2615_s28 = scalar_lea.hbm %s3618_s6, 512 }
  0xe0   : > { %p2616_p7 = scmp.ne.s32.totalorder %s3618_s6, %s2615_s28  ;;  %p2622_p1 = scmp.lt.u32.totalorder %s2615_s28, %s3618_s6 }
  0xe2   : > { %p2618_p9 = pnand %p2616_p7, %p3061_p8 }
  0xe4   : > { %p2619_p4 = pneg %p2618_p9 }
  0xe6   : > { %p2624_p3 = pnand %p2622_p1, %p2619_p4 }
  0xe8   : > { %2627 = shalt.err (!%p2624_p3)
}
  0xe9   : > { %s2628_s3 = scalar_lea.vmem %s455_s19, 512  ;;  %p2636_p13 = scmp.lt.s32.totalorder %s455_s19, %s455_s19 }
  0xea   : > { %p2629_p10 = scmp.ne.s32.totalorder %s455_s19, %s2628_s3  ;;  %p2637_p0 = scmp.lt.s32.totalorder %s2628_s3, %s2628_s3 }
  0xec   : > { %p2631_p11 = pnand %p2629_p10, %p3061_p8  ;;  %p2638_p2 = por %p2637_p0, %p2636_p13 }
  0xee   : > { %p2632_p12 = pneg %p2631_p11 }
  0xf0   : > { %p2639_p5 = pnand %p2638_p2, %p2632_p12 }
  0xf2   : > { %2642 = shalt.err (!%p2639_p5)
}
  0xf3   : > { %2222 = dma.hbm_to_vmem [thread:$0]  (!%p3045_p6), %s3618_s6, 512, %s455_s19, [#allocation15], %s2900_s29, %s2900_s29, %s2901_s20  }
  0xf4   : > { %s2908_s21 = smov [#allocation19]   ;;  %s2909_s23 = smov [#allocation22]  }
  0xf5   : > { %s479_s22 = sshll.u32 %s2908_s21, 4  ;;  %s500_s1 = sshll.u32 %s2909_s23, 4  ;;  %s480_s22 = int_to_ptr.vmem [resolvable:$true] %s479_s22  ;;  %s501_s1 = int_to_ptr.vmem [resolvable:$true] %s500_s1 }
  0xf6   : > { %s2643_s25 = scalar_lea.hbm %s3620_s8, 16 }
  0xf7   : > { %p2644_p7 = scmp.ne.s32.totalorder %s3620_s8, %s2643_s25  ;;  %p2650_p1 = scmp.lt.u32.totalorder %s2643_s25, %s3620_s8 }
  0xf9   : > { %p2646_p9 = pnand %p2644_p7, %p3061_p8 }
  0xfb   : > { %p2647_p4 = pneg %p2646_p9 }
  0xfd   : > { %p2652_p3 = pnand %p2650_p1, %p2647_p4 }
  0xff   : > { %2655 = shalt.err (!%p2652_p3)
}
 0x100   : > { %s2656_s19 = scalar_lea.vmem %s480_s22, 16  ;;  %s2663_s14 = scalar_lea.vmem %s480_s22, 32 }
 0x101   : > { %p2657_p10 = scmp.ne.s32.totalorder %s480_s22, %s2656_s19  ;;  %p2664_p13 = scmp.lt.s32.totalorder %s480_s22, %s480_s22 }
 0x102   : > { %p2665_p0 = scmp.lt.s32.totalorder %s2663_s14, %s2656_s19 }
 0x103   : > { %p2659_p11 = pnand %p2657_p10, %p3061_p8 }
 0x104   : > { %p2666_p2 = por %p2665_p0, %p2664_p13 }
 0x105   : > { %p2660_p12 = pneg %p2659_p11 }
 0x107   : > { %p2667_p5 = pnand %p2666_p2, %p2660_p12 }
 0x109   : > { %2670 = shalt.err (!%p2667_p5)
}
 0x10a   : > { %2228 = dma.hbm_to_vmem [thread:$0]  (!%p3045_p6), %s3620_s8, 16, %s480_s22, [#allocation18]  }
 0x10b   : > { %s2671_s25 = scalar_lea.hbm %s3622_s10, 256 }
 0x10c   : > { %p2672_p7 = scmp.ne.s32.totalorder %s3622_s10, %s2671_s25  ;;  %p2678_p1 = scmp.lt.u32.totalorder %s2671_s25, %s3622_s10 }
 0x10e   : > { %p2674_p9 = pnand %p2672_p7, %p3061_p8 }
 0x110   : > { %p2675_p4 = pneg %p2674_p9 }
 0x112   : > { %p2680_p3 = pnand %p2678_p1, %p2675_p4 }
 0x114   : > { %2683 = shalt.err (!%p2680_p3)
}
 0x115   : > { %s2684_s19 = scalar_lea.vmem %s501_s1, 256  ;;  %p2692_p13 = scmp.lt.s32.totalorder %s501_s1, %s501_s1 }
 0x116   : > { %p2685_p10 = scmp.ne.s32.totalorder %s501_s1, %s2684_s19  ;;  %p2693_p0 = scmp.lt.s32.totalorder %s2684_s19, %s2684_s19 }
 0x118   : > { %p2687_p11 = pnand %p2685_p10, %p3061_p8  ;;  %p2694_p2 = por %p2693_p0, %p2692_p13 }
 0x11a   : > { %p2688_p12 = pneg %p2687_p11 }
 0x11c   : > { %p2695_p5 = pnand %p2694_p2, %p2688_p12 }
 0x11e   : > { %2698 = shalt.err (!%p2695_p5)
}
 0x11f   : > { %2234 = dma.hbm_to_vmem [thread:$0]  (!%p3045_p6), %s3622_s10, 256, %s501_s1, [#allocation21], %s2900_s29, %s2900_s29, %s2901_s20  }
 0x120   : > { %s2910_s21 = smov [#allocation25]   ;;  %s2911_s28 = smov [#allocation26]  }
 0x121   : > { %s524_s23 = sshll.u32 %s2910_s21, 4  ;;  %s538_s0 = sshll.u32 %s2911_s28, 4  ;;  %s525_s23 = int_to_ptr.vmem [resolvable:$true] %s524_s23  ;;  %s539_s0 = int_to_ptr.vmem [resolvable:$true] %s538_s0 }
 0x122   : > { %s2699_s30 = scalar_lea.hbm %s3624_s12, 512 }
 0x123   : > { %p2700_p7 = scmp.ne.s32.totalorder %s3624_s12, %s2699_s30  ;;  %p2706_p1 = scmp.lt.u32.totalorder %s2699_s30, %s3624_s12 }
 0x125   : > { %p2702_p9 = pnand %p2700_p7, %p3061_p8 }
 0x127   : > { %p2703_p4 = pneg %p2702_p9 }
 0x129   : > { %p2708_p3 = pnand %p2706_p1, %p2703_p4 }
 0x12b   : > { %2711 = shalt.err (!%p2708_p3)
}
 0x12c   : > { %s2712_s1 = scalar_lea.vmem %s525_s23, 512  ;;  %p2720_p13 = scmp.lt.s32.totalorder %s525_s23, %s525_s23 }
 0x12d   : > { %p2713_p10 = scmp.ne.s32.totalorder %s525_s23, %s2712_s1  ;;  %p2721_p0 = scmp.lt.s32.totalorder %s2712_s1, %s2712_s1 }
 0x12f   : > { %p2715_p11 = pnand %p2713_p10, %p3061_p8  ;;  %p2722_p2 = por %p2721_p0, %p2720_p13 }
 0x131   : > { %p2716_p12 = pneg %p2715_p11 }
 0x133   : > { %p2723_p5 = pnand %p2722_p2, %p2716_p12 }
 0x135   : > { %2726 = shalt.err (!%p2723_p5)
}
 0x136   : > { %2240 = dma.hbm_to_vmem [thread:$0]  (!%p3045_p6), %s3624_s12, 512, %s525_s23, [#allocation24], %s2900_s29, %s2900_s29, %s2901_s20  }
 0x137   : > { %s2727_s27 = scalar_lea.hbm %s3625_s13, 16 }
 0x138   : > { %p2728_p7 = scmp.ne.s32.totalorder %s3625_s13, %s2727_s27  ;;  %p2734_p1 = scmp.lt.u32.totalorder %s2727_s27, %s3625_s13 }
 0x13a   : > { %p2730_p9 = pnand %p2728_p7, %p3061_p8 }
 0x13c   : > { %p2731_p4 = pneg %p2730_p9 }
 0x13e   : > { %p2736_p3 = pnand %p2734_p1, %p2731_p4 }
 0x140   : > { %2739 = shalt.err (!%p2736_p3)
}
 0x141   : > { %s2740_s22 = scalar_lea.vmem %s539_s0, 16  ;;  %s2747_s29 = scalar_lea.vmem %s539_s0, 32 }
 0x142   : > { %p2741_p10 = scmp.ne.s32.totalorder %s539_s0, %s2740_s22  ;;  %p2748_p13 = scmp.lt.s32.totalorder %s539_s0, %s539_s0 }
 0x143   : > { %p2749_p0 = scmp.lt.s32.totalorder %s2747_s29, %s2740_s22 }
 0x144   : > { %p2743_p11 = pnand %p2741_p10, %p3061_p8 }
 0x145   : > { %p2750_p2 = por %p2749_p0, %p2748_p13 }
 0x146   : > { %p2744_p12 = pneg %p2743_p11 }
 0x148   : > { %p2751_p5 = pnand %p2750_p2, %p2744_p12 }
 0x14a   : > { %2754 = shalt.err (!%p2751_p5)
}
 0x14b   : > { %s3655_s1 = sld [smem:[#allocation39_spill]]  ;;  %s3656_s24 = sld [smem:[#allocation38_spill]] }
 0x14c   : > { %s3657_s14 = sld [smem:[#allocation41_spill]]  ;;  %s1923_s21 = sadd.s32 4294967294, %s2895_s18  }
 0x14d   : > { %2243 = dma.hbm_to_vmem [thread:$0]  (!%p3045_p6), %s3625_s13, 16, %s539_s0, [#allocation27]  }
 0x14e   : > { %s49_s28 = sadd.s32 1, %s2891_s17  ;;  %s56_s26 = sadd.s32 1, %s2883_s15 }
 0x14f   : > { %p51_p8 = scmp.ge.s32.totalorder %s49_s28, 2  ;;  %p64_p9 = scmp.eq.s32.totalorder %s2895_s18, 0 }
 0x150   : > { %s3661_s30 = sadd.s32 4294967295, %s2895_s18   ;;  %p374_p12 = scmp.eq.s32.totalorder %s1923_s21, 1 }
 0x151   : > { %p63_p7 = scmp.ne.s32.totalorder %s2883_s15, %s3655_s1  ;;  %p69_p4 = scmp.ne.s32.totalorder %s3655_s1, %s3656_s24 }
 0x152   : > { %s3683_s28 = smov (%p51_p8, %s49_s28), 0  ;;  %p3659_p3 = scmp.ne.s32.totalorder %s3657_s14, 0 }
 0x153   : > { %p3327_p1 = por %p64_p9, %p63_p7  ;;  %s53_s27 = ssub.s32 %s2891_s17, %s3683_s28 }
 0x154   : > { %p3333_p6 = por %p3659_p3, %p69_p4  ;;  %p368_p10 = scmp.eq.s32.totalorder %s3661_s30, 1 }
 0x155   : > { %p54_p11 = scmp.eq.s32.totalorder %s53_s27, 0  ;;  %p2265_p0 = scmp.lt.s32.totalorder %s2895_s18, 2 }
 0x156   : > { %p3341_p13 = por %p368_p10, %p63_p7  ;;  %p3349_p2 = por %p374_p12, %p69_p4 }
 0x157   : > { %s3347_s16 = scalar_select %p54_p11, %s2883_s15, %s56_s26  }
 0x158   : > { %s3662_s3 = scalar_select %p3341_p13, 1, 0 }
 0x159   : > { %s3663_s19 = scalar_select %p3349_p2, 1, 0 }
 0x15a   : > { %s549_s22 = sand.u32 1, %s2883_s15   ;;  %s1940_s20 = sshll.u32 %s2891_s17, 7 }
 0x15b   : > { %s1939_s29 = sshll.u32 %s549_s22, 3  ;;  %s3664_s24 = sld [smem:[#allocation43_spill]] }
 0x15c   : > { %s553_s21 = scalar_lea.vmem [#allocation5], %s1939_s29  ;;  %p3364_p5 = pnand %p2265_p0, %p3327_p1 }
 0x15d   : > { %s560_s27 = sshll.u32 %s553_s21, 4  ;;  %s550_s30 = scalar_lea.sflag [#allocation6], %s549_s22  ;;  %s3360_s27 = int_to_ptr.vmem [resolvable:$true] %s560_s27 }
 0x15e   : > { %p2757_p7 = pneg %p3364_p5 }
 0x161   : > { %s3358_s14 = scalar_lea.hbm %s3664_s24, %s1940_s20  ;;  %s2760_s23 = scalar_lea.hbm %s3664_s24, 256 }
 0x162   : > { %s2755_s2 = scalar_lea.hbm %s3358_s14, 128  ;;  %p2761_p1 = scmp.lt.u32.totalorder %s3358_s14, %s3664_s24 }
 0x163   : > { %p2756_p8 = scmp.ne.s32.totalorder %s3358_s14, %s2755_s2  ;;  %p2762_p3 = scmp.lt.u32.totalorder %s2760_s23, %s2755_s2 }
 0x164   : > { %p2764_p11 = scmp.lt.u32.totalorder %s2755_s2, %s3358_s14 }
 0x165   : > { %p2758_p9 = pnand %p2757_p7, %p2756_p8  ;;  %p2763_p10 = por %p2762_p3, %p2761_p1 }
 0x167   : > { %p2759_p4 = pneg %p2758_p9  ;;  %p2765_p12 = por %p2764_p11, %p2763_p10 }
 0x169   : > { %p2766_p0 = pnand %p2765_p12, %p2759_p4 }
 0x16b   : > { %2769 = shalt.err (!%p2766_p0)
}
 0x16c   : > { %s2770_s22 = scalar_lea.vmem %s3360_s27, 128  ;;  %s2912_s21 = smov [#allocation5]  }
 0x16d   : > { %p2771_p8 = scmp.ne.s32.totalorder %s3360_s27, %s2770_s22  ;;  %s2775_s29 = sshll.u32 %s2912_s21, 4  ;;  %s2776_s29 = int_to_ptr.vmem [resolvable:$false] %s2775_s29 }
 0x16e   : > { %s2777_s20 = scalar_lea.vmem %s2776_s29, 256  ;;  %p2778_p13 = scmp.lt.s32.totalorder %s3360_s27, %s2776_s29 }
 0x16f   : > { %p2773_p9 = pnand %p2771_p8, %p2757_p7  ;;  %p2779_p1 = scmp.lt.s32.totalorder %s2777_s20, %s2770_s22 }
 0x171   : > { %p2774_p2 = pneg %p2773_p9  ;;  %p2780_p3 = por %p2779_p1, %p2778_p13 }
 0x173   : > { %p2781_p10 = pnand %p2780_p3, %p2774_p2 }
 0x175   : > { %2784 = shalt.err (!%p2781_p10)
}
 0x176   : > { %2247 = dma.hbm_to_vmem [thread:$0]  (!%p3364_p5), %s3358_s14, 128, %s3360_s27, %s550_s30  }
 0x177   : > { %s3666_s2 = sld [smem:[#allocation42_spill]] }
 0x17d   : > { %p3667_p4 = scmp.ne.s32.totalorder %s3666_s2, 0 }
 0x17e   : > { %s3668_s23 = sld [smem:[#allocation39_spill]] (!%p3667_p4) }
 0x17f   : > { %569 = sbr.rel (%p3667_p4) target bundleno = 2980 (0xba4), region = 76 }
 0x184   : > { %s3396_s25 = sand.u32 (!%p3667_p4), 1, %s3668_s23  }
 0x185   : > { %s1942_s1 = sshll.u32 (!%p3667_p4), %s3396_s25, 3  ;;  %s572_s22 = scalar_lea.sflag (!%p3667_p4), [#allocation6], %s3396_s25 }
 0x186   : > { %s575_s21 = scalar_lea.vmem [#allocation5], %s1942_s1 }
 0x187   : > { %2838 = dma.done.wait (%p3333_p6), %s572_s22, 128  }
 0x188   : > { %2840 = vsyncadd (%p3333_p6), %s572_s22, 4294967168  ;;  %s3669_s14 = sld [smem:[#allocation41_spill]] }
 0x18e   : > { %p3670_p13 = scmp.ne.s32.totalorder %s3669_s14, 0 }
 0x190   : > { %2842 = dma.done.wait (%p3670_p13), [#allocation9], 32  }
 0x191   : > { %2844 = vsyncadd (%p3670_p13), [#allocation9], 4294967264 }
 0x192   : > { %2846 = dma.done.wait (%p3670_p13), [#allocation12], 512  }
 0x193   : > { %2848 = vsyncadd (%p3670_p13), [#allocation12], 4294966784 }
 0x194   : > { %2850 = dma.done.wait (%p3670_p13), [#allocation15], 768  }
 0x195   : > { %2852 = vsyncadd (%p3670_p13), [#allocation15], 4294966528 }
 0x196   : > { %2854 = dma.done.wait (%p3670_p13), [#allocation18], 32  }
 0x197   : > { %2856 = vsyncadd (%p3670_p13), [#allocation18], 4294967264 }
 0x198   : > { %2858 = dma.done.wait (%p3670_p13), [#allocation21], 272  }
 0x199   : > { %2860 = vsyncadd (%p3670_p13), [#allocation21], 4294967024 }
 0x19a   : > { %2862 = dma.done.wait (%p3670_p13), [#allocation24], 528  }
 0x19b   : > { %2864 = vsyncadd (%p3670_p13), [#allocation24], 4294966768 }
 0x19c   : > { %2866 = dma.done.wait (%p3670_p13), [#allocation27], 16  }
 0x19d   : > { %2868 = vsyncadd (%p3670_p13), [#allocation27], 4294967280  ;;  %vm680_vm0 = vcmask 261120   ;;  %v3434_v0 = vld [vmem:[%s575_s21] sm:$0xff]  ;;  %v2353_v13 = vld [vmem:[#allocation11] sm:$0xff]   ;;  %v2913_v14 = vmov 0.0  }
 0x19e   : > { %v681_v1 = vsel %vm680_vm0, %v3434_v0, 0.0  ;;  %v2351_v12 = vld [vmem:[#allocation13] sm:$0xff]   ;;  %2044 = vmatprep.subr.bf16.mxu1 %v2913_v14  ;;  %2060 = vmatprep.subr.bf16.mxu0 %v2913_v14  ;;  %v2352_v15 = vld [vmem:[#allocation13 + $0x8] sm:$0xff]   ;;  %vm2914_vm1 = vmmov 0   ;;  %v2355_v16 = vld [vmem:[#allocation11 + $0x8] sm:$0xff]   ;;  %vm827_vm2 = vcmask 125952  }
 0x19f   : > { %682 = vadd.xlane.f32.xlu0 %v681_v1  ;;  %2045 = vmatpush3.bf16.msra.mxu1 %v2351_v12  ;;  %v1957_v24 = vld [vmem:[#allocation8] ss:$0 sm:$0xff]  ;;  %v1958_v26 = vld [vmem:[#allocation10] ss:$0 sm:$0xff]  ;;  %v2354_v31 = vld [vmem:[#allocation14] sm:$0xff]   ;;  %s2915_s0 = smov 112  }
 0x1a0   : > { %2061 = vmatpush3.bf16.msra.mxu0 %v2353_v13  ;;  %2046 = vmatprep.subr.bf16.mxu1 %v2913_v14  ;;  %v2356_v35 = vld [vmem:[#allocation14 + $0x8] sm:$0xff]   ;;  %s2916_s27 = smov 96   ;;  %s2917_s26 = smov 80   ;;  %vm993_vm3 = vcmask 130048   ;;  %vm1230_vm4 = vcmask 1043456   ;;  %vm1178_vm5 = vcmask 64512  }
 0x1a1   : > { %2048 = vmatprep.mubr.msk.bf16.mxu1 %vm2914_vm1, %v2913_v14  ;;  %2062 = vmatprep.subr.bf16.mxu0 %v2913_v14  ;;  %s2918_s30 = smov 32   ;;  %s2919_s29 = smov 16   ;;  %vm1430_vm6 = vcmask 392192   ;;  %vm1472_vm7 = vcmask 523264  }
 0x1a2   : > { %2064 = vmatprep.mubr.msk.bf16.mxu0 %vm2914_vm1, %v2913_v14  ;;  %s2920_s20 = smov 48   ;;  %s3671_s2 = sld [smem:[#allocation40_spill]] }
 0x1a3   : > { %873 = vadd.xlane.f32.xlu0 %v681_v1  ;;  %2047 = vmatpush3.bf16.msra.mxu1 %v2352_v15  ;;  %s671_s22 = scalar_lea.vmem [#allocation28], %s1942_s1  ;;  %p3673_p2 = scmp.ne.s32.totalorder %s3662_s3, 0 }
 0x1a4   : > { %2052 = vmatprep.subr.bf16.mxu1 %v2913_v14  ;;  %2063 = vmatpush3.bf16.msra.mxu0 %v2355_v16  ;;  %s1717_s21 = sshll.u32 %s671_s22, 4  ;;  %s3564_s21 = int_to_ptr.vmem [resolvable:$true] %s1717_s21 }
 0x1a5   : > { %2074 = vmatprep.subr.bf16.mxu0 %v2913_v14  ;;  %s2785_s1 = scalar_lea.vmem %s3564_s21, 128 }
 0x1a6   : > { %p2786_p6 = scmp.ne.s32.totalorder %s3564_s21, %s2785_s1 }
 0x1a8   : > { %s2000_s23 = sshll.u32 %s3671_s2, 7  ;;  %p2787_p5 = pnand %p2786_p6, %p3673_p2 }
 0x1aa   : > { %p2788_p7 = pneg %p2787_p5 }
 0x22c   : > { %v683_v2 = vpop.xlane.xlu0 %682 }
 0x22d   : > { %v685_v3 = vmul.f32 0.03125, %v683_v2 }
 0x22f   : > { %v686_v4 = vsub.f32 %v3434_v0, %v685_v3 }
 0x230   : > { %v874_v5 = vpop.xlane.xlu0 %873 }
 0x231   : > { %v876_v6 = vmul.f32 0.03125, %v874_v5  ;;  %v687_v7 = vmul.f32 %v686_v4, %v686_v4 }
 0x233   : > { %v877_v8 = vsub.f32 %v3434_v0, %v876_v6  ;;  %v688_v9 = vsel %vm680_vm0, %v687_v7, 0.0 }
 0x234   : > { %689 = vadd.xlane.f32.xlu1 %v688_v9 }
 0x235   : > { %v878_v10 = vmul.f32 %v877_v8, %v877_v8 }
 0x237   : > { %v879_v11 = vsel %vm680_vm0, %v878_v10, 0.0 }
 0x238   : > { %880 = vadd.xlane.f32.xlu1 %v879_v11 }
 0x2c1   : > { %v690_v17 = vpop.xlane.xlu1 %689 }
 0x2c2   : > { %v691_v18 = vmul.f32 0.03125, %v690_v17 }
 0x2c4   : > { %v692_v19 = vadd.f32 1e-05, %v691_v18 }
 0x2c5   : > { %v881_v20 = vpop.xlane.xlu1 %880 }
 0x2c6   : > { %2367 = vrsqrt.f32 %v692_v19  ;;  %v882_v21 = vmul.f32 0.03125, %v881_v20 }
 0x2c8   : > { %v883_v22 = vadd.f32 1e-05, %v882_v21 }
 0x2ca   : > { %2369 = vrsqrt.f32 %v883_v22 }
 0x2d0   : > { %v2368_v23 = vpop.eup %2367 }
 0x2d1   : > { %v694_v25 = vmul.f32 %v2368_v23, %v686_v4 }
 0x2d3   : > { %v701_v27 = vmul.f32 %v1957_v24, %v694_v25 }
 0x2d4   : > { %v2370_v28 = vpop.eup %2369 }
 0x2d5   : > { %v708_v29 = vadd.f32 %v1958_v26, %v701_v27  ;;  %v885_v30 = vmul.f32 %v2370_v28, %v877_v8 }
 0x2d7   : > { %v709_v32 = vpack.c.bf16 %v708_v29, %v708_v29  ;;  %v892_v33 = vmul.f32 %v1957_v24, %v885_v30 }
 0x2d9   : > { %2049 = vmatmul.mubr.msk.bf16.vlgmr.msra.gmra.mrb[0].mxu1 %vm680_vm0, %v709_v32  ;;  %v899_v34 = vadd.f32 %v1958_v26, %v892_v33 }
 0x2da   : > { %2053 = vmatpush3.bf16.msra.mxu1 %v2354_v31  ;;  %2056 = vmatprep.mubr.msk.bf16.mxu1 %vm2914_vm1, %v2913_v14 }
 0x2db   : > { %2054 = vmatprep.subr.bf16.mxu1 %v2913_v14  ;;  %v900_v36 = vpack.c.bf16 %v899_v34, %v899_v34 }
 0x2dd   : > { %2065 = vmatmul.mubr.msk.bf16.vlgmr.msra.gmra.mrb[0].mxu0 %vm680_vm0, %v900_v36 }
 0x2de   : > { %2055 = vmatpush3.bf16.msra.mxu1 %v2356_v35  ;;  %2076 = vmatprep.mubr.msk.bf16.mxu0 %vm2914_vm1, %v2913_v14 }
 0x2df   : > { %2068 = vmatprep.subr.bf16.mxu1 %v2913_v14 }
 0x2e1   : > { %2057 = vmatmul.mubr.msk.bf16.vlgmr.msra.gmra.mrb[4].mxu1 %vm680_vm0, %v709_v32 }
 0x2e2   : > { %2070 = vmatprep.mubr.msk.bf16.mxu1 %vm2914_vm1, %v2913_v14 }
 0x3ac   : > { %v763_v37 = vpop.f32.mrb[0].mxu1 }
 0x3ad   : > { %v769_v38 = vpack.c.bf16 %v763_v37, %v763_v37  ;;  %v2050_v39 = vpop.f32.mrb[1].mxu1 }
 0x3ae   : > { %v766_v40 = vpop.f32.mrb[2].mxu1 }
 0x3af   : > { %828 = vst.msk [vmem:[#allocation2] sm:$0xf] %vm827_vm2, %v769_v38  ;;  %833 = vrot.lane.b32.xlu0 %v769_v38, %s2915_s0  ;;  %v2051_v41 = vpop.f32.mrb[3].mxu1  ;;  %846 = vrot.lane.b32.xlu1 %v769_v38, %s2916_s27 }
 0x3b0   : > { %v954_v42 = vpop.f32.mrb[0].mxu0 }
 0x3b1   : > { %v960_v43 = vpack.c.bf16 %v954_v42, %v954_v42  ;;  %v2066_v44 = vpop.f32.mrb[1].mxu0 }
 0x3b2   : > { %v957_v45 = vpop.f32.mrb[2].mxu0 }
 0x3b3   : > { %962 = vst.msk [vmem:[#allocation4] sm:$0xf] %vm827_vm2, %v960_v43  ;;  %856 = vrot.lane.b32.xlu1 %v769_v38, %s2917_s26  ;;  %971 = vrot.lane.b32.xlu0 %v960_v43, %s2916_s27  ;;  %v2067_v46 = vpop.f32.mrb[3].mxu0 }
 0x3b4   : > { %v820_v47 = vpop.f32.mrb[4].mxu1 }
 0x3b5   : > { %v3469_v48 = vpack.c.bf16 %v820_v47, %v820_v47  ;;  %v2058_v49 = vpop.f32.mrb[5].mxu1 }
 0x3b6   : > { %v823_v50 = vpop.f32.mrb[6].mxu1  ;;  %v985_v51 = vld [vmem:[#allocation2] sm:$0xf] }
 0x3b7   : > { %829 = vst.msk [vmem:[#allocation3] sm:$0xf] %vm827_vm2, %v3469_v48  ;;  %v2059_v52 = vpop.f32.mrb[7].mxu1  ;;  %966 = vrot.lane.b32.xlu1 %v960_v43, %s2915_s0  ;;  %v998_v53 = vsel %vm993_vm3, %v985_v51, 0 }
 0x3b8   : > { %2069 = vmatpush3.bf16.xpose.msra.mxu1 %v998_v53 }
 0x3b9   : > { %2080 = vmatprep.subr.bf16.mxu1 %v2913_v14 }
 0x3ba   : > { %v981_v54 = vld [vmem:[#allocation4] sm:$0xf] }
 0x3bb   : > { %976 = vrot.lane.b32.xlu1 %v960_v43, %s2917_s26 }
 0x3be   : > { %v989_v3 = vld [vmem:[#allocation3] sm:$0xf] }
 0x3bf   : > { %2071 = vmatmul.mubr.msk.bf16.vlgmr.msra.gmra.mrb[8].mxu1 %vm993_vm3, %v981_v54  ;;  %v1232_v7 = vsel %vm1230_vm4, %v989_v3, 0 }
 0x3c0   : > { %2082 = vmatprep.mubr.msk.bf16.mxu1 %vm2914_vm1, %v2913_v14 }
 0x421   : > { %v847_v55 = vpop.permute.xlu1 %846  ;;  %v834_v56 = vpop.permute.xlu0 %833 }
 0x422   : > { %850 = vst.msk [vmem:[#allocation2 + $0x8] sm:$0xf] %vm827_vm2, %v847_v55  ;;  %837 = vst.msk [vmem:[#allocation2 + $0x4] sm:$0xf] %vm827_vm2, %v834_v56 }
 0x425   : > { %v857_v57 = vpop.permute.xlu1 %856  ;;  %v972_v58 = vpop.permute.xlu0 %971 }
 0x426   : > { %860 = vst.msk [vmem:[#allocation2 + $0xc] sm:$0xf] %vm827_vm2, %v857_v57  ;;  %975 = vst.msk [vmem:[#allocation4 + $0x8] sm:$0xf] %vm827_vm2, %v972_v58 }
 0x429   : > { %v967_v59 = vpop.permute.xlu1 %966  ;;  %v986_v60 = vld [vmem:[#allocation2 + $0x4] sm:$0xf]  ;;  %v987_v61 = vld [vmem:[#allocation2 + $0x8] sm:$0xf] }
 0x42a   : > { %970 = vst.msk [vmem:[#allocation4 + $0x4] sm:$0xf] %vm827_vm2, %v967_v59  ;;  %v1044_v62 = vsel %vm993_vm3, %v986_v60, 0  ;;  %v1090_v63 = vsel %vm993_vm3, %v987_v61, 0 }
 0x42b   : > { %2075 = vmatpush3.bf16.xpose.msra.mxu0 %v1044_v62  ;;  %2081 = vmatpush3.bf16.xpose.msra.mxu1 %v1090_v63 }
 0x42c   : > { %2086 = vmatprep.subr.bf16.mxu0 %v2913_v14  ;;  %2092 = vmatprep.subr.bf16.mxu1 %v2913_v14 }
 0x42d   : > { %v977_v1 = vpop.permute.xlu1 %976  ;;  %v988_v2 = vld [vmem:[#allocation2 + $0xc] sm:$0xf]  ;;  %v983_v5 = vld [vmem:[#allocation4 + $0x8] sm:$0xf] }
 0x42e   : > { %980 = vst.msk [vmem:[#allocation4 + $0xc] sm:$0xf] %vm827_vm2, %v977_v1  ;;  %v1136_v6 = vsel %vm993_vm3, %v988_v2, 0 }
 0x431   : > { %v982_v4 = vld [vmem:[#allocation4 + $0x4] sm:$0xf] }
 0x432   : > { %2077 = vmatmul.mubr.msk.bf16.vlgmr.msra.gmra.mrb[4].mxu0 %vm993_vm3, %v982_v4  ;;  %2083 = vmatmul.mubr.msk.bf16.vlgmr.msra.gmra.mrb[12].mxu1 %vm993_vm3, %v983_v5 }
 0x433   : > { %2087 = vmatpush3.bf16.xpose.msra.mxu0 %v1136_v6  ;;  %2093 = vmatpush3.bf16.msra.mxu1 %v1232_v7 }
 0x434   : > { %2088 = vmatprep.mubr.msk.bf16.mxu0 %vm2914_vm1, %v2913_v14  ;;  %2094 = vmatprep.mubr.msk.bf16.mxu1 %vm2914_vm1, %v2913_v14 }
 0x435   : > { %2098 = vmatprep.subr.bf16.mxu0 %v2913_v14  ;;  %2104 = vmatprep.subr.bf16.mxu1 %v2913_v14  ;;  %v984_v8 = vld [vmem:[#allocation4 + $0xc] sm:$0xf] }
 0x43a   : > { %2089 = vmatmul.mubr.msk.bf16.vlgmr.msra.gmra.mrb[8].mxu0 %vm993_vm3, %v984_v8 }
 0x43b   : > { %2100 = vmatprep.mubr.msk.bf16.mxu0 %vm2914_vm1, %v2913_v14 }
 0x492   : > { %v1034_v9 = vpop.f32.mrb[8].mxu1 }
 0x493   : > { %v2072_v10 = vpop.f32.mrb[9].mxu1  ;;  %v1179_v11 = vsel %vm1178_vm5, %v1034_v9, -inf }
 0x494   : > { %1180 = vmax.xlane.f32.xlu0 %v1179_v11  ;;  %v1037_v12 = vpop.f32.mrb[10].mxu1 }
 0x495   : > { %v2073_v13 = vpop.f32.mrb[11].mxu1 }
 0x505   : > { %v1080_v15 = vpop.f32.mrb[4].mxu0  ;;  %v1126_v16 = vpop.f32.mrb[12].mxu1 }
 0x506   : > { %v2078_v17 = vpop.f32.mrb[5].mxu0  ;;  %v2084_v18 = vpop.f32.mrb[13].mxu1  ;;  %v1182_v19 = vsel %vm1178_vm5, %v1080_v15, -inf  ;;  %v1185_v20 = vsel %vm1178_vm5, %v1126_v16, -inf }
 0x507   : > { %1183 = vmax.xlane.f32.xlu1 %v1182_v19  ;;  %v1083_v21 = vpop.f32.mrb[6].mxu0  ;;  %1186 = vmax.xlane.f32.xlu0 %v1185_v20  ;;  %v1129_v22 = vpop.f32.mrb[14].mxu1  ;;  %v2357_v17 = vld [vmem:[#allocation16] sm:$0xff]   ;;  %v2358_v18 = vld [vmem:[#allocation16 + $0x8] sm:$0xff]   ;;  %v2359_v19 = vld [vmem:[#allocation16 + $0x10] sm:$0xff]  }
 0x508   : > { %v2079_v23 = vpop.f32.mrb[7].mxu0  ;;  %v2085_v24 = vpop.f32.mrb[15].mxu1 }
 0x50d   : > { %v1172_v25 = vpop.f32.mrb[8].mxu0 }
 0x50e   : > { %v2090_v26 = vpop.f32.mrb[9].mxu0  ;;  %v1188_v27 = vsel %vm1178_vm5, %v1172_v25, -inf }
 0x50f   : > { %v1175_v28 = vpop.f32.mrb[10].mxu0  ;;  %1189 = vmax.xlane.f32.xlu0 %v1188_v27  ;;  %v2360_v27 = vld [vmem:[#allocation16 + $0x18] sm:$0xff]  }
 0x510   : > { %v2091_v29 = vpop.f32.mrb[11].mxu0 }
 0x521   : > { %v1181_v30 = vpop.xlane.xlu0 %1180 }
 0x522   : > { %v1191_v31 = vsub.f32 %v1034_v9, %v1181_v30 }
 0x524   : > { %v1195_v32 = vmul.f32 1.442695, %v1191_v31 }
 0x526   : > { %2371 = vpow2.f32 %v1195_v32 }
 0x530   : > { %v2372_v33 = vpop.eup %2371 }
 0x531   : > { %v1203_v34 = vsel %vm1178_vm5, %v2372_v33, 0.0 }
 0x532   : > { %1204 = vadd.xlane.f32.xlu0 %v1203_v34 }
 0x594   : > { %v1184_v35 = vpop.xlane.xlu1 %1183  ;;  %v1187_v36 = vpop.xlane.xlu0 %1186 }
 0x595   : > { %v1192_v37 = vsub.f32 %v1080_v15, %v1184_v35  ;;  %v1193_v38 = vsub.f32 %v1126_v16, %v1187_v36 }
 0x597   : > { %v1197_v39 = vmul.f32 1.442695, %v1192_v37  ;;  %v1199_v40 = vmul.f32 1.442695, %v1193_v38 }
 0x599   : > { %2373 = vpow2.f32 %v1197_v39 }
 0x59a   : > { %2375 = vpow2.f32 %v1199_v40 }
 0x59c   : > { %v1190_v45 = vpop.xlane.xlu0 %1189 }
 0x59d   : > { %v1194_v47 = vsub.f32 %v1172_v25, %v1190_v45 }
 0x59f   : > { %v1201_v49 = vmul.f32 1.442695, %v1194_v47 }
 0x5a3   : > { %v2374_v41 = vpop.eup %2373 }
 0x5a4   : > { %v2376_v42 = vpop.eup %2375  ;;  %v1206_v43 = vsel %vm1178_vm5, %v2374_v41, 0.0 }
 0x5a5   : > { %1207 = vadd.xlane.f32.xlu1 %v1206_v43  ;;  %v1209_v44 = vsel %vm1178_vm5, %v2376_v42, 0.0  ;;  %v1981_v43 = vld [vmem:[#allocation17] ss:$0 sm:$0xff] }
 0x5a6   : > { %1210 = vadd.xlane.f32.xlu0 %v1209_v44 }
 0x5b6   : > { %851 = vrot.lane.b32.xlu1 %v3469_v48, %s2916_s27  ;;  %s3672_s27 = sld [smem:[#allocation47_spill]] }
 0x5bc   : > { %841 = vrot.lane.b32.xlu0 %v3469_v48, %s2915_s0 }
 0x5bf   : > { %v1205_v46 = vpop.xlane.xlu0 %1204 }
 0x5c0   : > { %2377 = vrcp.f32 %v1205_v46 }
 0x5c1   : > { %2379 = vpow2.f32 %v1201_v49 }
 0x5ca   : > { %v2378_v50 = vpop.eup %2377 }
 0x5cb   : > { %v1219_v51 = vmul.f32 %v2378_v50, %v2372_v33  ;;  %v2380_v53 = vpop.eup %2379 }
 0x5cc   : > { %v1212_v54 = vsel %vm1178_vm5, %v2380_v53, 0.0 }
 0x5cd   : > { %v1223_v52 = vpack.c.bf16 %v1219_v51, %v1219_v51 }
 0x5cf   : > { %2095 = vmatmul.mubr.msk.bf16.vlgmr.msra.gmra.mrb[16].mxu1 %vm1178_vm5, %v1223_v52 }
 0x5d0   : > { %2106 = vmatprep.mubr.msk.bf16.mxu1 %vm2914_vm1, %v2913_v14 }
 0x5da   : > { %1213 = vadd.xlane.f32.xlu1 %v1212_v54 }
 0x5eb   : > { %861 = vrot.lane.b32.xlu1 %v3469_v48, %s2917_s26  ;;  %s3562_s26 = scalar_lea.hbm %s3672_s27, %s2000_s23 }
 0x632   : > { %v1208_v55 = vpop.xlane.xlu1 %1207 }
 0x633   : > { %2381 = vrcp.f32 %v1208_v55  ;;  %v1211_v56 = vpop.xlane.xlu0 %1210 }
 0x634   : > { %2383 = vrcp.f32 %v1211_v56 }
 0x636   : > { %v852_v57 = vpop.permute.xlu1 %851 }
 0x637   : > { %855 = vst.msk [vmem:[#allocation3 + $0x8] sm:$0xf] %vm827_vm2, %v852_v57  ;;  %v842_v58 = vpop.permute.xlu0 %841  ;;  %v2361_v57 = vld [vmem:[#allocation22] sm:$0xff]  }
 0x638   : > { %845 = vst.msk [vmem:[#allocation3 + $0x4] sm:$0xf] %vm827_vm2, %v842_v58  ;;  %v2362_v58 = vld [vmem:[#allocation22 + $0x8] sm:$0xff]  }
 0x63d   : > { %v2382_v59 = vpop.eup %2381 }
 0x63e   : > { %v2384_v60 = vpop.eup %2383  ;;  %v1220_v61 = vmul.f32 %v2382_v59, %v2374_v41  ;;  %v991_v62 = vld [vmem:[#allocation3 + $0x8] sm:$0xf] }
 0x63f   : > { %v1221_v63 = vmul.f32 %v2384_v60, %v2376_v42  ;;  %v990_v1 = vld [vmem:[#allocation3 + $0x4] sm:$0xf]  ;;  %v1324_v2 = vsel %vm1230_vm4, %v991_v62, 0 }
 0x640   : > { %v1278_v48 = vsel %vm1230_vm4, %v990_v1, 0  ;;  %2105 = vmatpush3.bf16.msra.mxu1 %v1324_v2  ;;  %v1224_v3 = vpack.c.bf16 %v1220_v61, %v1220_v61  ;;  %v1987_v62 = vld [vmem:[#allocation19] ss:$0 sm:$0xff]  ;;  %v1988_v1 = vld [vmem:[#allocation20] ss:$0 sm:$0xff] }
 0x641   : > { %2099 = vmatpush3.bf16.msra.mxu0 %v1278_v48  ;;  %v1225_v4 = vpack.c.bf16 %v1221_v63, %v1221_v63  ;;  %2116 = vmatprep.subr.bf16.mxu1 %v2913_v14 }
 0x642   : > { %2110 = vmatprep.subr.bf16.mxu0 %v2913_v14 }
 0x643   : > { %2107 = vmatmul.mubr.msk.bf16.vlgmr.msra.gmra.mrb[20].mxu1 %vm1178_vm5, %v1225_v4  ;;  %v2363_v4 = vld [vmem:[#allocation25] sm:$0xff]  }
 0x644   : > { %2101 = vmatmul.mubr.msk.bf16.vlgmr.msra.gmra.mrb[12].mxu0 %vm1178_vm5, %v1224_v3  ;;  %2124 = vmatprep.mubr.msk.bf16.mxu1 %vm2914_vm1, %v2913_v14 }
 0x645   : > { %2112 = vmatprep.mubr.msk.bf16.mxu0 %vm2914_vm1, %v2913_v14  ;;  %2117 = vmatpush3.bf16.msra.mxu1 %v2357_v17 }
 0x646   : > { %2118 = vmatprep.subr.bf16.mxu1 %v2913_v14 }
 0x649   : > { %2119 = vmatpush3.bf16.msra.mxu1 %v2358_v18 }
 0x64a   : > { %2120 = vmatprep.subr.bf16.mxu1 %v2913_v14 }
 0x64d   : > { %2121 = vmatpush3.bf16.msra.mxu1 %v2359_v19 }
 0x64e   : > { %2122 = vmatprep.subr.bf16.mxu1 %v2913_v14 }
 0x651   : > { %2123 = vmatpush3.bf16.msra.mxu1 %v2360_v27 }
 0x667   : > { %v1214_v5 = vpop.xlane.xlu1 %1213 }
 0x668   : > { %2385 = vrcp.f32 %v1214_v5  ;;  %v2364_v5 = vld [vmem:[#allocation25 + $0x8] sm:$0xff]  }
 0x66b   : > { %v862_v6 = vpop.permute.xlu1 %861 }
 0x66c   : > { %865 = vst.msk [vmem:[#allocation3 + $0xc] sm:$0xf] %vm827_vm2, %v862_v6  ;;  %v2365_v6 = vld [vmem:[#allocation25 + $0x10] sm:$0xff]  }
 0x672   : > { %v2386_v7 = vpop.eup %2385 }
 0x673   : > { %v1222_v8 = vmul.f32 %v2386_v7, %v2380_v53  ;;  %v992_v9 = vld [vmem:[#allocation3 + $0xc] sm:$0xf]  ;;  %v2366_v7 = vld [vmem:[#allocation25 + $0x18] sm:$0xff]  }
 0x674   : > { %v1370_v10 = vsel %vm1230_vm4, %v992_v9, 0 }
 0x675   : > { %2111 = vmatpush3.bf16.msra.mxu0 %v1370_v10  ;;  %v1226_v11 = vpack.c.bf16 %v1222_v8, %v1222_v8  ;;  %v1989_v8 = vld [vmem:[#allocation23] ss:$0 sm:$0xff] }
 0x676   : > { %2128 = vmatprep.subr.bf16.mxu0 %v2913_v14 }
 0x678   : > { %2113 = vmatmul.mubr.msk.bf16.vlgmr.msra.gmra.mrb[16].mxu0 %vm1178_vm5, %v1226_v11 }
 0x679   : > { %2132 = vmatprep.mubr.msk.bf16.mxu0 %vm2914_vm1, %v2913_v14  ;;  %2129 = vmatpush3.bf16.msra.mxu0 %v2361_v57 }
 0x67a   : > { %2130 = vmatprep.subr.bf16.mxu0 %v2913_v14 }
 0x67d   : > { %2131 = vmatpush3.bf16.msra.mxu0 %v2362_v58 }
 0x67e   : > { %2136 = vmatprep.subr.bf16.mxu0 %v2913_v14 }
 0x6a2   : > { %v1268_v12 = vpop.f32.mrb[16].mxu1 }
 0x6a3   : > { %v2096_v13 = vpop.f32.mrb[17].mxu1  ;;  %v1412_v37 = vpack.c.bf16 %v1268_v12, %v1268_v12 }
 0x6a4   : > { %v1271_v15 = vpop.f32.mrb[18].mxu1 }
 0x6a5   : > { %v2097_v16 = vpop.f32.mrb[19].mxu1 }
 0x716   : > { %v1360_v20 = vpop.f32.mrb[20].mxu1 }
 0x717   : > { %v1314_v21 = vpop.f32.mrb[12].mxu0  ;;  %v1414_v22 = vpack.c.bf16 %v1360_v20, %v1360_v20  ;;  %v2108_v23 = vpop.f32.mrb[21].mxu1 }
 0x718   : > { %v1413_v24 = vpack.c.bf16 %v1314_v21, %v1314_v21  ;;  %v2102_v25 = vpop.f32.mrb[13].mxu0  ;;  %v1363_v26 = vpop.f32.mrb[22].mxu1 }
 0x719   : > { %v1317_v28 = vpop.f32.mrb[14].mxu0  ;;  %1420 = vrot.lane.b32.xlu0 %v1414_v22, %s2918_s30  ;;  %v2109_v29 = vpop.f32.mrb[23].mxu1  ;;  %s1703_s30 = scalar_lea.sflag [#allocation7], %s3396_s25 }
 0x71a   : > { %1417 = vrot.lane.b32.xlu1 %v1413_v24, %s2919_s29  ;;  %v2103_v30 = vpop.f32.mrb[15].mxu0  ;;  %s2921_s29 = smov [#allocation28]  }
 0x74b   : > { %v1406_v31 = vpop.f32.mrb[16].mxu0 }
 0x74c   : > { %v1415_v32 = vpack.c.bf16 %v1406_v31, %v1406_v31  ;;  %v2114_v33 = vpop.f32.mrb[17].mxu0 }
 0x74d   : > { %v1409_v34 = vpop.f32.mrb[18].mxu0 }
 0x74e   : > { %1423 = vrot.lane.b32.xlu1 %v1415_v32, %s2920_s20  ;;  %v2115_v35 = vpop.f32.mrb[19].mxu0  ;;  %s2789_s20 = sshll.u32 %s2921_s29, 4  ;;  %s2790_s20 = int_to_ptr.vmem [resolvable:$false] %s2789_s20 }
 0x74f   : > { %s2791_s2 = scalar_lea.vmem %s2790_s20, 256  ;;  %p2792_p11 = scmp.lt.s32.totalorder %s3564_s21, %s2790_s20 }
 0x750   : > { %p2793_p12 = scmp.lt.s32.totalorder %s2791_s2, %s2785_s1 }
 0x752   : > { %p2794_p0 = por %p2793_p12, %p2792_p11 }
 0x754   : > { %p2795_p8 = pnand %p2794_p0, %p2788_p7 }
 0x78b   : > { %v1421_v39 = vpop.permute.xlu0 %1420 }
 0x78c   : > { %v1418_v36 = vpop.permute.xlu1 %1417 }
 0x78d   : > { %v1427_v38 = vsel %vm993_vm3, %v1412_v37, %v1418_v36 }
 0x78e   : > { %v1429_v40 = vsel %vm680_vm0, %v1427_v38, %v1421_v39 }
 0x7c0   : > { %v1424_v41 = vpop.permute.xlu1 %1423 }
 0x7c1   : > { %v1432_v42 = vsel %vm1430_vm6, %v1429_v40, %v1424_v41 }
 0x7c2   : > { %2125 = vmatmul.mubr.msk.bf16.vlgmr.msra.gmra.mrb[24].mxu1 %vm1472_vm7, %v1432_v42 }
 0x895   : > { %v1509_v44 = vpop.f32.mrb[24].mxu1 }
 0x896   : > { %v1510_v45 = vadd.f32 %v1981_v43, %v1509_v44  ;;  %v2126_v46 = vpop.f32.mrb[25].mxu1 }
 0x897   : > { %v1512_v47 = vpop.f32.mrb[26].mxu1 }
 0x898   : > { %v1515_v49 = vadd.f32 %v1510_v45, %v3434_v0  ;;  %v2127_v50 = vpop.f32.mrb[27].mxu1 }
 0x89a   : > { %v1518_v51 = vsel %vm680_vm0, %v1515_v49, 0.0 }
 0x89b   : > { %1519 = vadd.xlane.f32.xlu0 %v1518_v51 }
 0x928   : > { %v1520_v52 = vpop.xlane.xlu0 %1519 }
 0x929   : > { %v1521_v53 = vmul.f32 0.03125, %v1520_v52 }
 0x92b   : > { %v1522_v54 = vsub.f32 %v1515_v49, %v1521_v53 }
 0x92d   : > { %v1523_v55 = vmul.f32 %v1522_v54, %v1522_v54 }
 0x92f   : > { %v1524_v56 = vsel %vm680_vm0, %v1523_v55, 0.0 }
 0x930   : > { %1525 = vadd.xlane.f32.xlu1 %v1524_v56 }
 0x9bd   : > { %v1526_v0 = vpop.xlane.xlu1 %1525 }
 0x9be   : > { %v1527_v59 = vmul.f32 0.03125, %v1526_v0 }
 0x9c0   : > { %v1528_v60 = vadd.f32 1e-05, %v1527_v59 }
 0x9c2   : > { %2387 = vrsqrt.f32 %v1528_v60 }
 0x9cc   : > { %v2388_v61 = vpop.eup %2387 }
 0x9cd   : > { %v1530_v63 = vmul.f32 %v2388_v61, %v1522_v54 }
 0x9cf   : > { %v1537_v2 = vmul.f32 %v1987_v62, %v1530_v63 }
 0x9d1   : > { %v1544_v48 = vadd.f32 %v1988_v1, %v1537_v2 }
 0x9d3   : > { %v1545_v3 = vpack.c.bf16 %v1544_v48, %v1544_v48 }
 0x9d5   : > { %2133 = vmatmul.mubr.msk.bf16.vlgmr.msra.gmra.mrb[20].mxu0 %vm680_vm0, %v1545_v3 }
 0x9d6   : > { %2144 = vmatprep.mubr.msk.bf16.mxu0 %vm2914_vm1, %v2913_v14  ;;  %2137 = vmatpush3.bf16.msra.mxu0 %v2363_v4 }
 0x9d7   : > { %2138 = vmatprep.subr.bf16.mxu0 %v2913_v14 }
 0x9da   : > { %2139 = vmatpush3.bf16.msra.mxu0 %v2364_v5 }
 0x9db   : > { %2140 = vmatprep.subr.bf16.mxu0 %v2913_v14 }
 0x9de   : > { %2141 = vmatpush3.bf16.msra.mxu0 %v2365_v6 }
 0x9df   : > { %2142 = vmatprep.subr.bf16.mxu0 %v2913_v14  ;;  %v1993_v14 = vld [vmem:[#allocation26] ss:$0 sm:$0xff] }
 0x9e2   : > { %2143 = vmatpush3.bf16.msra.mxu0 %v2366_v7 }
 0xaa8   : > { %v1606_v9 = vpop.f32.mrb[20].mxu0 }
 0xaa9   : > { %v1607_v10 = vadd.f32 %v1989_v8, %v1606_v9  ;;  %v2134_v11 = vpop.f32.mrb[21].mxu0 }
 0xaaa   : > { %v1609_v12 = vpop.f32.mrb[22].mxu0 }
 0xaab   : > { %v1613_v13 = vmul.f32 0.70710677, %v1607_v10  ;;  %v2135_v15 = vpop.f32.mrb[23].mxu0  ;;  %v1612_v17 = vmul.f32 0.5, %v1607_v10 }
 0xaad   : > { %2389 = verf.f32 %v1613_v13 }
 0xab7   : > { %v2390_v16 = vpop.eup %2389 }
 0xab8   : > { %v1615_v18 = vadd.f32 1.0, %v2390_v16 }
 0xaba   : > { %v1616_v19 = vmul.f32 %v1615_v18, %v1612_v17 }
 0xabc   : > { %v1617_v20 = vpack.c.bf16 %v1616_v19, %v1616_v19 }
 0xabe   : > { %2145 = vmatmul.mubr.msk.bf16.vlgmr.msra.gmra.mrb[24].mxu0 %vm1472_vm7, %v1617_v20 }
 0xb91   : > { %v1694_v21 = vpop.f32.mrb[24].mxu0 }
 0xb92   : > { %v1695_v22 = vadd.f32 %v1993_v14, %v1694_v21  ;;  %v2146_v23 = vpop.f32.mrb[25].mxu0 }
 0xb93   : > { %v1697_v24 = vpop.f32.mrb[26].mxu0 }
 0xb94   : > { %v1700_v25 = vadd.f32 %v1695_v22, %v1515_v49  ;;  %v2147_v26 = vpop.f32.mrb[27].mxu0 }
 0xb96   : > { %1701 = vst.msk [vmem:[%s671_s22] sm:$0xff] %vm680_vm0, %v1700_v25 }
 0xb97   : > { %2798 = shalt.err (!%p2795_p8)
}
 0xb98   : > { %s2799_s25 = scalar_lea.hbm %s3562_s26, 128  ;;  %s2803_s14 = scalar_lea.hbm %s3672_s27, 256 }
 0xb99   : > { %p2800_p9 = scmp.ne.s32.totalorder %s3562_s26, %s2799_s25  ;;  %p2804_p10 = scmp.lt.u32.totalorder %s3562_s26, %s3672_s27 }
 0xb9a   : > { %p2805_p4 = scmp.lt.u32.totalorder %s2803_s14, %s2799_s25  ;;  %p2807_p6 = scmp.lt.u32.totalorder %s2799_s25, %s3562_s26 }
 0xb9b   : > { %p2801_p1 = pnand %p2800_p9, %p3673_p2 }
 0xb9c   : > { %p2806_p13 = por %p2805_p4, %p2804_p10 }
 0xb9d   : > { %p2802_p3 = pneg %p2801_p1 }
 0xb9e   : > { %p2808_p5 = por %p2807_p6, %p2806_p13 }
 0xba0   : > { %p2809_p7 = pnand %p2808_p5, %p2802_p3 }
 0xba2   : > { %2812 = shalt.err (!%p2809_p7)
}
 0xba3   : > { %2202 = dma.vmem_to_hbm [thread:$0]  (%p3673_p2), %s3564_s21, 128, %s3562_s26, %s1703_s30  }
 0xba4 PF: > { %s3674_s1 = sld [smem:[#allocation38_spill]]  ;;  %p3675_p11 = scmp.ne.s32.totalorder %s3663_s19, 0 }
 0xba5   : > { %p3676_p12 = scmp.ge.s32.totalorder %s2895_s18, 2 }
 0xba7   : > { %p2249_p0 = pnand %p3676_p12, %p3675_p11 }
 0xbaa   : > { %s1729_s20 = sand.u32 1, %s3674_s1  }
 0xbab   : > { %s1730_s2 = scalar_lea.sflag [#allocation7], %s1729_s20 }
 0xbac   : > { %2870 = dma.done.wait (!%p2249_p0), %s1730_s2, 128  }
 0xbad   : > { %2872 = vsyncadd (!%p2249_p0), %s1730_s2, 4294967168  ;;  %s37_s18 = sadd.s32 1, %s2895_s18   ;;  %s3677_s29 = sld [smem:[#allocation39_spill]] }
 0xbae   : > { %p34_p8 = scmp.ge.s32.totalorder %s37_s18, 4   ;;  %s3678_s30 = smov %s2883_s15 }
 0xbaf   : > { %s3679_s15 = smov %s3347_s16  ;;  %s3680_s16 = smov %s2891_s17 }
 0xbb0   : > { %s3681_s17 = smov %s3683_s28  ;;  %36 = sbr.rel (!%p34_p8) target bundleno = 19 (0x13), region = 187 }
 0xbb7   :  { %1735 = vsyncpa [#allocation6], 1 }
 0xbb8   :  { %1737 = vsyncpa [#allocation6 + $0x1], 1 }
 0xbb9   :  { %1738 = vsyncpa [#allocation9], 1 }
 0xbba   :  { %1739 = vsyncpa [#allocation12], 1 }
 0xbbb   :  { %1740 = vsyncpa [#allocation15], 1 }
 0xbbc   :  { %1741 = vsyncpa [#allocation18], 1 }
 0xbbd   :  { %1742 = vsyncpa [#allocation21], 1 }
 0xbbe   :  { %1743 = vsyncpa [#allocation24], 1 }
 0xbbf   :  { %1744 = vsyncpa [#allocation27], 1 }
 0xbc0   :  { %1745 = vsyncpa [#allocation7], 1 }
 0xbc1   :  { %1747 = vsyncpa [#allocation7 + $0x1], 1 }

</bundles_post_ra>
